<compile_context>
chip_gen: v6e
topology: v6e:2x2x1
jax: 0.10.0
libtpu: 0.0.40
codegen_flags: <defaults>
</compile_context>

<pallas_src>
import functools
import math

import jax
import jax.numpy as jnp
from jax.experimental import pallas as pl
from jax.experimental.pallas import tpu as pltpu

NEG_INF = -1e9
MXU_COMPUTE_DTYPE = jnp.float32  # set to jnp.bfloat16 on v6e/v7x for full MXU throughput


def _pick_tile(dim, candidates):
    for c in candidates:
        if c <= dim and dim % c == 0:
            return c
    return dim


# ----------------------------------------------------------------------------
# Tiled linear: y = x @ W^T + b  (PyTorch nn.Linear convention, W is (Dout, Din))
# ----------------------------------------------------------------------------
def _linear_kernel(x_ref, w_ref, b_ref, o_ref, acc_ref, *, activation, compute_dtype):
    @pl.when(pl.program_id(2) == 0)
    def _():
        acc_ref[...] = jnp.zeros_like(acc_ref)

    # contract x dim 1 with w dim 1 (no in-kernel transpose)
    acc_ref[...] += jax.lax.dot_general(
        x_ref[...].astype(compute_dtype),
        w_ref[...].astype(compute_dtype),
        dimension_numbers=(((1,), (1,)), ((), ())),
        preferred_element_type=jnp.float32,
    )

    @pl.when(pl.program_id(2) == pl.num_programs(2) - 1)
    def _():
        y = acc_ref[...] + b_ref[...]
        if activation == "relu":
            y = jnp.maximum(y, 0.0)
        o_ref[...] = y.astype(o_ref.dtype)


def linear(x, w, b, activation=None, compute_dtype=None):
    # x: (M, Din), w: (Dout, Din), b: (Dout,)
    if compute_dtype is None:
        compute_dtype = MXU_COMPUTE_DTYPE
    m, din = x.shape
    dout = w.shape[0]
    tm = _pick_tile(m, (512, 256, 128, 64, 32, 16, 8))
    tn = _pick_tile(dout, (256, 128))
    tk = _pick_tile(din, (512, 256, 128))
    grid = (m // tm, dout // tn, din // tk)
    return pl.pallas_call(
        functools.partial(_linear_kernel, activation=activation,
                          compute_dtype=compute_dtype),
        grid=grid,
        in_specs=[
            pl.BlockSpec((tm, tk), lambda i, j, kk: (i, kk)),
            pl.BlockSpec((tn, tk), lambda i, j, kk: (j, kk)),
            pl.BlockSpec((1, tn), lambda i, j, kk: (0, j)),
        ],
        out_specs=pl.BlockSpec((tm, tn), lambda i, j, kk: (i, j)),
        out_shape=jax.ShapeDtypeStruct((m, dout), x.dtype),
        scratch_shapes=[pltpu.VMEM((tm, tn), jnp.float32)],
        compiler_params=pltpu.CompilerParams(
            dimension_semantics=("parallel", "parallel", "arbitrary"),
            vmem_limit_bytes=64 * 1024 * 1024,
        ),
    )(x, w, b.reshape(1, dout))


# ----------------------------------------------------------------------------
# Attention kernels (one grid step = one batch element, all heads)
# ----------------------------------------------------------------------------
def _self_attn_kernel(q_ref, k_ref, v_ref, cmask_ref, pad_ref, o_ref, *,
                      num_heads, scale):
    d = q_ref.shape[2]
    dh = d // num_heads
    q = q_ref[0].astype(jnp.float32)     # (T, D)
    k = k_ref[0].astype(jnp.float32)     # (T, D)
    v = v_ref[0].astype(jnp.float32)     # (T, D)
    # combine causal (T,T) + key-padding (1,T) additive masks once, outside head loop
    mask = cmask_ref[...] + pad_ref[0]   # (T, T)

    outs = []
    for hh in range(num_heads):
        sl = slice(hh * dh, (hh + 1) * dh)
        qh, kh, vh = q[:, sl], k[:, sl], v[:, sl]
        sc = jax.lax.dot_general(qh, kh, (((1,), (1,)), ((), ())),
                                 preferred_element_type=jnp.float32) * scale + mask
        mx = jnp.max(sc, axis=-1, keepdims=True)
        e = jnp.exp(sc - mx)
        p = e * pl.reciprocal(jnp.sum(e, axis=-1, keepdims=True), approx=True)
        outs.append(jnp.dot(p, vh, preferred_element_type=jnp.float32))
    # single lane-dense (T, D) store
    o_ref[0] = jnp.concatenate(outs, axis=-1).astype(o_ref.dtype)


def self_attention(q, k, v, causal_mask, pad_add, num_heads, scale):
    # q/k/v: (B, T, D); causal_mask: (T, T) additive f32; pad_add: (B, 1, T) additive f32
    b, t, d = q.shape
    return pl.pallas_call(
        functools.partial(_self_attn_kernel, num_heads=num_heads, scale=scale),
        grid=(b,),
        in_specs=[
            pl.BlockSpec((1, t, d), lambda i: (i, 0, 0)),
            pl.BlockSpec((1, t, d), lambda i: (i, 0, 0)),
            pl.BlockSpec((1, t, d), lambda i: (i, 0, 0)),
            pl.BlockSpec((t, t), lambda i: (0, 0)),
            pl.BlockSpec((1, 1, t), lambda i: (i, 0, 0)),
        ],
        out_specs=pl.BlockSpec((1, t, d), lambda i: (i, 0, 0)),
        out_shape=jax.ShapeDtypeStruct((b, t, d), q.dtype),
        compiler_params=pltpu.CompilerParams(dimension_semantics=("parallel",)),
    )(q, k, v, causal_mask, pad_add)


def _cross_attn_kernel(q_ref, k_ref, v_ref, o_ref, w_ref, *, num_heads, scale):
    d = q_ref.shape[2]
    dh = d // num_heads
    q = q_ref[0].astype(jnp.float32)     # (T, D)
    k = k_ref[0].astype(jnp.float32)     # (S, D)
    v = v_ref[0].astype(jnp.float32)     # (S, D)

    outs = []
    for hh in range(num_heads):
        sl = slice(hh * dh, (hh + 1) * dh)
        sc = jax.lax.dot_general(q[:, sl], k[:, sl], (((1,), (1,)), ((), ())),
                                 preferred_element_type=jnp.float32) * scale
        mx = jnp.max(sc, axis=-1, keepdims=True)
        e = jnp.exp(sc - mx)
        p = e * pl.reciprocal(jnp.sum(e, axis=-1, keepdims=True), approx=True)
        w_ref[0, hh] = p.astype(w_ref.dtype)
        outs.append(jnp.dot(p, v[:, sl], preferred_element_type=jnp.float32))
    o_ref[0] = jnp.concatenate(outs, axis=-1).astype(o_ref.dtype)


def cross_attention(q, k, v, num_heads, scale):
    # q: (B, T, D); k/v: (B, S, D). No mask. Returns (B,T,D) and weights (B,H,T,S).
    b, t, d = q.shape
    s = k.shape[1]
    return pl.pallas_call(
        functools.partial(_cross_attn_kernel, num_heads=num_heads, scale=scale),
        grid=(b,),
        in_specs=[
            pl.BlockSpec((1, t, d), lambda i: (i, 0, 0)),
            pl.BlockSpec((1, s, d), lambda i: (i, 0, 0)),
            pl.BlockSpec((1, s, d), lambda i: (i, 0, 0)),
        ],
        out_specs=[
            pl.BlockSpec((1, t, d), lambda i: (i, 0, 0)),
            pl.BlockSpec((1, num_heads, t, s), lambda i: (i, 0, 0, 0)),
        ],
        out_shape=[
            jax.ShapeDtypeStruct((b, t, d), q.dtype),
            jax.ShapeDtypeStruct((b, num_heads, t, s), jnp.float32),
        ],
        compiler_params=pltpu.CompilerParams(dimension_semantics=("parallel",)),
    )(q, k, v)


# ----------------------------------------------------------------------------
# Fused residual-add + LayerNorm, row-tiled
# ----------------------------------------------------------------------------
def _add_ln_kernel(x_ref, r_ref, g_ref, b_ref, o_ref, *, eps):
    x = x_ref[...].astype(jnp.float32) + r_ref[...].astype(jnp.float32)
    mean = jnp.mean(x, axis=-1, keepdims=True)
    var = jnp.mean(jnp.square(x - mean), axis=-1, keepdims=True)
    y = (x - mean) * jax.lax.rsqrt(var + eps)
    o_ref[...] = (y * g_ref[...] + b_ref[...]).astype(o_ref.dtype)


def add_layernorm(x, res, gamma, beta, eps=1e-5):
    m, d = x.shape
    tr = _pick_tile(m, (512, 256, 128, 64, 32, 16, 8))
    return pl.pallas_call(
        functools.partial(_add_ln_kernel, eps=eps),
        grid=(m // tr,),
        in_specs=[
            pl.BlockSpec((tr, d), lambda i: (i, 0)),
            pl.BlockSpec((tr, d), lambda i: (i, 0)),
            pl.BlockSpec((1, d), lambda i: (0, 0)),
            pl.BlockSpec((1, d), lambda i: (0, 0)),
        ],
        out_specs=pl.BlockSpec((tr, d), lambda i: (i, 0)),
        out_shape=jax.ShapeDtypeStruct((m, d), x.dtype),
        compiler_params=pltpu.CompilerParams(dimension_semantics=("parallel",)),
    )(x, res, gamma.reshape(1, d), beta.reshape(1, d))


# ----------------------------------------------------------------------------
# DecoderLayer forward (eval semantics; dropout = identity)
# ----------------------------------------------------------------------------
def decoder_layer(params, dec_inputs, enc_outputs, tgt_mask, tgt_pad_mask, num_heads):
    t, b, d = dec_inputs.shape
    s = enc_outputs.shape[0]
    h = num_heads
    dh = d // h
    scale = 1.0 / math.sqrt(dh)

    # batch-major internally: one transpose in, one transpose out for the whole layer
    x_bm = jnp.transpose(dec_inputs, (1, 0, 2))      # (B, T, D)
    enc_bm = jnp.transpose(enc_outputs, (1, 0, 2))   # (B, S, D)
    pad_add = jnp.where(tgt_pad_mask, NEG_INF, 0.0).astype(jnp.float32).reshape(b, 1, t)
    causal = tgt_mask.astype(jnp.float32)            # (T, T) additive

    # --- self attention (fused QKV projection) + residual + LN ---------------
    p_sa = params["self_attn"]
    x_flat = x_bm.reshape(b * t, d)
    qkv = linear(x_flat, p_sa["in_proj_weight"], p_sa["in_proj_bias"])   # (BT, 3D)
    q = qkv[:, :d].reshape(b, t, d)
    k = qkv[:, d:2 * d].reshape(b, t, d)
    v = qkv[:, 2 * d:].reshape(b, t, d)
    sa = self_attention(q, k, v, causal, pad_add, h, scale)              # (B, T, D)
    sa = linear(sa.reshape(b * t, d), p_sa["out_proj_weight"], p_sa["out_proj_bias"])
    # TODO(synk): dropout layers skipped (eval semantics / p=0).
    x1 = add_layernorm(sa, x_flat,
                       params["self_attn_norm"]["gamma"],
                       params["self_attn_norm"]["beta"])                 # (BT, D)

    # --- cross attention (fused KV projection) + residual + LN ---------------
    p_ca = params["cross_attn"]
    wq, bq = p_ca["in_proj_weight"][:d], p_ca["in_proj_bias"][:d]
    wkv, bkv = p_ca["in_proj_weight"][d:], p_ca["in_proj_bias"][d:]
    q2 = linear(x1, wq, bq).reshape(b, t, d)
    kv = linear(enc_bm.reshape(b * s, d), wkv, bkv)                      # (BS, 2D)
    k2 = kv[:, :d].reshape(b, s, d)
    v2 = kv[:, d:].reshape(b, s, d)
    ca, attns = cross_attention(q2, k2, v2, h, scale)                    # (B,T,D),(B,H,T,S)
    ca = linear(ca.reshape(b * t, d), p_ca["out_proj_weight"], p_ca["out_proj_bias"])
    x2 = add_layernorm(ca, x1,
                       params["multihead_norm"]["gamma"],
                       params["multihead_norm"]["beta"])                 # (BT, D)

    # --- feed-forward + residual + LN -----------------------------------------
    ff1 = linear(x2, params["ff"]["w1"], params["ff"]["b1"], activation="relu")
    ff2 = linear(ff1, params["ff"]["w2"], params["ff"]["b2"])
    out = add_layernorm(ff2, x2,
                        params["ff_norm"]["gamma"], params["ff_norm"]["beta"])

    out = jnp.transpose(out.reshape(b, t, d), (1, 0, 2))                 # back to (T, B, D)
    return out, attns


# ----------------------------------------------------------------------------
# Deterministic parameter init (shapes match nn.MultiheadAttention / Linear / LN)
# ----------------------------------------------------------------------------
def init_params(key, d_model, ff_dim):
    ks = jax.random.split(key, 12)
    scale = 0.02

    def attn_params(k0, k1):
        return {
            "in_proj_weight": scale * jax.random.normal(k0, (3 * d_model, d_model), jnp.float32),
            "in_proj_bias": jnp.zeros((3 * d_model,), jnp.float32),
            "out_proj_weight": scale * jax.random.normal(k1, (d_model, d_model), jnp.float32),
            "out_proj_bias": jnp.zeros((d_model,), jnp.float32),
        }

    def ln_params():
        return {"gamma": jnp.ones((d_model,), jnp.float32),
                "beta": jnp.zeros((d_model,), jnp.float32)}

    return {
        "self_attn": attn_params(ks[0], ks[1]),
        "cross_attn": attn_params(ks[2], ks[3]),
        "self_attn_norm": ln_params(),
        "multihead_norm": ln_params(),
        "ff_norm": ln_params(),
        "ff": {
            "w1": scale * jax.random.normal(ks[4], (ff_dim, d_model), jnp.float32),
            "b1": jnp.zeros((ff_dim,), jnp.float32),
            "w2": scale * jax.random.normal(ks[5], (d_model, ff_dim), jnp.float32),
            "b2": jnp.zeros((d_model,), jnp.float32),
        },
    }


if __name__ == "__main__":
    d_model, num_heads, ff_dim = 32, 4, 64
    tgt_len, src_len, batch = 8, 8, 2

    key = jax.random.PRNGKey(0)
    k_param, k_dec, k_enc = jax.random.split(key, 3)

    params = init_params(k_param, d_model, ff_dim)

    dec_inputs = jax.random.normal(k_dec, (tgt_len, batch, d_model), jnp.float32)
    enc_outputs = jax.random.normal(k_enc, (src_len, batch, d_model), jnp.float32)

    # causal additive mask (0 allowed / NEG_INF disallowed)
    tgt_mask = jnp.where(jnp.triu(jnp.ones((tgt_len, tgt_len), bool), k=1),
                         NEG_INF, 0.0).astype(jnp.float32)
    # key padding mask: mask out the last position of batch element 1
    tgt_pad_mask = jnp.zeros((batch, tgt_len), bool).at[1, tgt_len - 1].set(True)

    fwd = jax.jit(functools.partial(decoder_layer, num_heads=num_heads))
    out, attns = fwd(params, dec_inputs, enc_outputs, tgt_mask, tgt_pad_mask)
    jax.block_until_ready((out, attns))

    assert out.shape == (tgt_len, batch, d_model)
    assert attns.shape == (batch, num_heads, tgt_len, src_len)
    print("KERNEL_OK")
</pallas_src>

<mosaic_0001>
module attributes {stable_mosaic.version = 11 : i64} {
  func.func @_linear_kernel(%arg0: i32, %arg1: i32, %arg2: i32, %arg3: memref<16x32xf32, #tpu.memory_space<vmem>>, %arg4: memref<96x32xf32, #tpu.memory_space<vmem>>, %arg5: memref<1x96xf32, #tpu.memory_space<vmem>>, %arg6: memref<16x96xf32, #tpu.memory_space<vmem>>, %arg7: memref<16x96xf32, #tpu.memory_space<vmem>>) attributes {dimension_semantics = [#tpu.dimension_semantics<parallel>, #tpu.dimension_semantics<parallel>, #tpu.dimension_semantics<arbitrary>], iteration_bounds = array<i64: 1, 1, 1>, scalar_prefetch = 0 : i64, scratch_operands = 1 : i64, tpu.core_type = #tpu.core_type<tc>, window_params = [{transform_indices = @transform_0, window_bounds = array<i64: 16, 32>}, {transform_indices = @transform_1, window_bounds = array<i64: 96, 32>}, {transform_indices = @transform_2, window_bounds = array<i64: 1, 96>}, {transform_indices = @transform_3, window_bounds = array<i64: 16, 96>}]} {
    %c0_i32 = arith.constant 0 : i32
    %0 = arith.cmpi eq, %arg2, %c0_i32 : i32
    %1 = arith.extui %0 : i1 to i32
    %c0_i32_0 = arith.constant 0 : i32
    %2 = arith.cmpi ne, %1, %c0_i32_0 : i32
    scf.if %2 {
      %cst_10 = arith.constant 0.000000e+00 : f32
      %12 = vector.broadcast %cst_10 : f32 to vector<16x96xf32>
      %c0_11 = arith.constant 0 : index
      %c0_12 = arith.constant 0 : index
      %13 = vector.load %arg7[%c0_11, %c0_12] : memref<16x96xf32, #tpu.memory_space<vmem>>, vector<16x96xf32>
      tpu.vector_store %arg7[%c0_11, %c0_12], %12 {strides = array<i32>} : memref<16x96xf32, #tpu.memory_space<vmem>>, vector<16x96xf32>,
    } else {
    }
    %c0 = arith.constant 0 : index
    %c0_1 = arith.constant 0 : index
    %3 = vector.load %arg7[%c0, %c0_1] : memref<16x96xf32, #tpu.memory_space<vmem>>, vector<16x96xf32>
    %c0_2 = arith.constant 0 : index
    %c0_3 = arith.constant 0 : index
    %4 = vector.load %arg3[%c0_2, %c0_3] : memref<16x32xf32, #tpu.memory_space<vmem>>, vector<16x32xf32>
    %c0_4 = arith.constant 0 : index
    %c0_5 = arith.constant 0 : index
    %5 = vector.load %arg4[%c0_4, %c0_5] : memref<96x32xf32, #tpu.memory_space<vmem>>, vector<96x32xf32>
    %cst = arith.constant dense<0.000000e+00> : vector<16x96xf32>
    %6 = tpu.matmul %4, %5, %cst {dimension_numbers = #tpu.dot_dimension_numbers<[1], [1], [0], [0], [0, 0, 1, 0], [], []>} : vector<16x32xf32>, vector<96x32xf32>, vector<16x96xf32> -> vector<16x96xf32>
    %7 = arith.addf %3, %6 : vector<16x96xf32>
    %c0_6 = arith.constant 0 : index
    %c0_7 = arith.constant 0 : index
    %8 = vector.load %arg7[%c0_6, %c0_7] : memref<16x96xf32, #tpu.memory_space<vmem>>, vector<16x96xf32>
    tpu.vector_store %arg7[%c0_6, %c0_7], %7 {strides = array<i32>} : memref<16x96xf32, #tpu.memory_space<vmem>>, vector<16x96xf32>,
    %c0_i32_8 = arith.constant 0 : i32
    %9 = arith.cmpi eq, %arg2, %c0_i32_8 : i32
    %10 = arith.extui %9 : i1 to i32
    %c0_i32_9 = arith.constant 0 : i32
    %11 = arith.cmpi ne, %10, %c0_i32_9 : i32
    scf.if %11 {
      %c0_10 = arith.constant 0 : index
      %c0_11 = arith.constant 0 : index
      %12 = vector.load %arg7[%c0_10, %c0_11] : memref<16x96xf32, #tpu.memory_space<vmem>>, vector<16x96xf32>
      %c0_12 = arith.constant 0 : index
      %c0_13 = arith.constant 0 : index
      %13 = vector.load %arg5[%c0_12, %c0_13] : memref<1x96xf32, #tpu.memory_space<vmem>>, vector<1x96xf32>
      %14 = vector.broadcast %13 : vector<1x96xf32> to vector<16x96xf32>
      %15 = arith.addf %12, %14 : vector<16x96xf32>
      %c0_14 = arith.constant 0 : index
      %c0_15 = arith.constant 0 : index
      %16 = vector.load %arg6[%c0_14, %c0_15] : memref<16x96xf32, #tpu.memory_space<vmem>>, vector<16x96xf32>
      tpu.vector_store %arg6[%c0_14, %c0_15], %15 {strides = array<i32>} : memref<16x96xf32, #tpu.memory_space<vmem>>, vector<16x96xf32>,
    } else {
    }
    return
  }
  func.func @transform_0(%arg0: i32, %arg1: i32, %arg2: i32) -> (i32, i32) {
    %c0_i32 = arith.constant 0 : i32
    return %arg0, %arg2 : i32, i32
  }
  func.func @transform_1(%arg0: i32, %arg1: i32, %arg2: i32) -> (i32, i32) {
    %c0_i32 = arith.constant 0 : i32
    return %arg1, %arg2 : i32, i32
  }
  func.func @transform_2(%arg0: i32, %arg1: i32, %arg2: i32) -> (i32, i32) {
    %c0_i32 = arith.constant 0 : i32
    %c0_i32_0 = arith.constant 0 : i32
    return %c0_i32, %arg1 : i32, i32
  }
  func.func @transform_3(%arg0: i32, %arg1: i32, %arg2: i32) -> (i32, i32) {
    %c0_i32 = arith.constant 0 : i32
    return %arg0, %arg1 : i32, i32
  }
}

module attributes {stable_mosaic.version = 11 : i64} {
  func.func @_linear_kernel(%arg0: i32, %arg1: i32, %arg2: i32, %arg3: memref<16x32xf32, #tpu.memory_space<vmem>>, %arg4: memref<32x32xf32, #tpu.memory_space<vmem>>, %arg5: memref<1x32xf32, #tpu.memory_space<vmem>>, %arg6: memref<16x32xf32, #tpu.memory_space<vmem>>, %arg7: memref<16x32xf32, #tpu.memory_space<vmem>>) attributes {dimension_semantics = [#tpu.dimension_semantics<parallel>, #tpu.dimension_semantics<parallel>, #tpu.dimension_semantics<arbitrary>], iteration_bounds = array<i64: 1, 1, 1>, scalar_prefetch = 0 : i64, scratch_operands = 1 : i64, tpu.core_type = #tpu.core_type<tc>, window_params = [{transform_indices = @transform_0, window_bounds = array<i64: 16, 32>}, {transform_indices = @transform_1, window_bounds = array<i64: 32, 32>}, {transform_indices = @transform_2, window_bounds = array<i64: 1, 32>}, {transform_indices = @transform_3, window_bounds = array<i64: 16, 32>}]} {
    %c0_i32 = arith.constant 0 : i32
    %0 = arith.cmpi eq, %arg2, %c0_i32 : i32
    %1 = arith.extui %0 : i1 to i32
    %c0_i32_0 = arith.constant 0 : i32
    %2 = arith.cmpi ne, %1, %c0_i32_0 : i32
    scf.if %2 {
      %cst_10 = arith.constant 0.000000e+00 : f32
      %12 = vector.broadcast %cst_10 : f32 to vector<16x32xf32>
      %c0_11 = arith.constant 0 : index
      %c0_12 = arith.constant 0 : index
      %13 = vector.load %arg7[%c0_11, %c0_12] : memref<16x32xf32, #tpu.memory_space<vmem>>, vector<16x32xf32>
      tpu.vector_store %arg7[%c0_11, %c0_12], %12 {strides = array<i32>} : memref<16x32xf32, #tpu.memory_space<vmem>>, vector<16x32xf32>,
    } else {
    }
    %c0 = arith.constant 0 : index
    %c0_1 = arith.constant 0 : index
    %3 = vector.load %arg7[%c0, %c0_1] : memref<16x32xf32, #tpu.memory_space<vmem>>, vector<16x32xf32>
    %c0_2 = arith.constant 0 : index
    %c0_3 = arith.constant 0 : index
    %4 = vector.load %arg3[%c0_2, %c0_3] : memref<16x32xf32, #tpu.memory_space<vmem>>, vector<16x32xf32>
    %c0_4 = arith.constant 0 : index
    %c0_5 = arith.constant 0 : index
    %5 = vector.load %arg4[%c0_4, %c0_5] : memref<32x32xf32, #tpu.memory_space<vmem>>, vector<32x32xf32>
    %cst = arith.constant dense<0.000000e+00> : vector<16x32xf32>
    %6 = tpu.matmul %4, %5, %cst {dimension_numbers = #tpu.dot_dimension_numbers<[1], [1], [0], [0], [0, 0, 1, 0], [], []>} : vector<16x32xf32>, vector<32x32xf32>, vector<16x32xf32> -> vector<16x32xf32>
    %7 = arith.addf %3, %6 : vector<16x32xf32>
    %c0_6 = arith.constant 0 : index
    %c0_7 = arith.constant 0 : index
    %8 = vector.load %arg7[%c0_6, %c0_7] : memref<16x32xf32, #tpu.memory_space<vmem>>, vector<16x32xf32>
    tpu.vector_store %arg7[%c0_6, %c0_7], %7 {strides = array<i32>} : memref<16x32xf32, #tpu.memory_space<vmem>>, vector<16x32xf32>,
    %c0_i32_8 = arith.constant 0 : i32
    %9 = arith.cmpi eq, %arg2, %c0_i32_8 : i32
    %10 = arith.extui %9 : i1 to i32
    %c0_i32_9 = arith.constant 0 : i32
    %11 = arith.cmpi ne, %10, %c0_i32_9 : i32
    scf.if %11 {
      %c0_10 = arith.constant 0 : index
      %c0_11 = arith.constant 0 : index
      %12 = vector.load %arg7[%c0_10, %c0_11] : memref<16x32xf32, #tpu.memory_space<vmem>>, vector<16x32xf32>
      %c0_12 = arith.constant 0 : index
      %c0_13 = arith.constant 0 : index
      %13 = vector.load %arg5[%c0_12, %c0_13] : memref<1x32xf32, #tpu.memory_space<vmem>>, vector<1x32xf32>
      %14 = vector.broadcast %13 : vector<1x32xf32> to vector<16x32xf32>
      %15 = arith.addf %12, %14 : vector<16x32xf32>
      %c0_14 = arith.constant 0 : index
      %c0_15 = arith.constant 0 : index
      %16 = vector.load %arg6[%c0_14, %c0_15] : memref<16x32xf32, #tpu.memory_space<vmem>>, vector<16x32xf32>
      tpu.vector_store %arg6[%c0_14, %c0_15], %15 {strides = array<i32>} : memref<16x32xf32, #tpu.memory_space<vmem>>, vector<16x32xf32>,
    } else {
    }
    return
  }
  func.func @transform_0(%arg0: i32, %arg1: i32, %arg2: i32) -> (i32, i32) {
    %c0_i32 = arith.constant 0 : i32
    return %arg0, %arg2 : i32, i32
  }
  func.func @transform_1(%arg0: i32, %arg1: i32, %arg2: i32) -> (i32, i32) {
    %c0_i32 = arith.constant 0 : i32
    return %arg1, %arg2 : i32, i32
  }
  func.func @transform_2(%arg0: i32, %arg1: i32, %arg2: i32) -> (i32, i32) {
    %c0_i32 = arith.constant 0 : i32
    %c0_i32_0 = arith.constant 0 : i32
    return %c0_i32, %arg1 : i32, i32
  }
  func.func @transform_3(%arg0: i32, %arg1: i32, %arg2: i32) -> (i32, i32) {
    %c0_i32 = arith.constant 0 : i32
    return %arg0, %arg1 : i32, i32
  }
}

module attributes {stable_mosaic.version = 11 : i64} {
  func.func @_add_ln_kernel(%arg0: i32, %arg1: memref<16x32xf32, #tpu.memory_space<vmem>>, %arg2: memref<16x32xf32, #tpu.memory_space<vmem>>, %arg3: memref<1x32xf32, #tpu.memory_space<vmem>>, %arg4: memref<1x32xf32, #tpu.memory_space<vmem>>, %arg5: memref<16x32xf32, #tpu.memory_space<vmem>>) attributes {dimension_semantics = [#tpu.dimension_semantics<parallel>], iteration_bounds = array<i64: 1>, scalar_prefetch = 0 : i64, scratch_operands = 0 : i64, tpu.core_type = #tpu.core_type<tc>, window_params = [{transform_indices = @transform_0, window_bounds = array<i64: 16, 32>}, {transform_indices = @transform_1, window_bounds = array<i64: 16, 32>}, {pipeline_mode = #tpu.pipeline_mode<synchronous>, transform_indices = @transform_2, window_bounds = array<i64: 1, 32>}, {pipeline_mode = #tpu.pipeline_mode<synchronous>, transform_indices = @transform_3, window_bounds = array<i64: 1, 32>}, {transform_indices = @transform_4, window_bounds = array<i64: 16, 32>}]} {
    %c0 = arith.constant 0 : index
    %c0_0 = arith.constant 0 : index
    %0 = vector.load %arg1[%c0, %c0_0] : memref<16x32xf32, #tpu.memory_space<vmem>>, vector<16x32xf32>
    %c0_1 = arith.constant 0 : index
    %c0_2 = arith.constant 0 : index
    %1 = vector.load %arg2[%c0_1, %c0_2] : memref<16x32xf32, #tpu.memory_space<vmem>>, vector<16x32xf32>
    %2 = arith.addf %0, %1 : vector<16x32xf32>
    %cst = arith.constant dense<0.000000e+00> : vector<16xf32>
    %3 = vector.multi_reduction <add>, %2, %cst [1] : vector<16x32xf32> to vector<16xf32>
    %4 = vector.shape_cast %3 : vector<16xf32> to vector<16x1xf32>
    %cst_3 = arith.constant 3.200000e+01 : f32
    %5 = vector.broadcast %cst_3 : f32 to vector<16x1xf32>
    %6 = arith.divf %4, %5 : vector<16x1xf32>
    %7 = vector.broadcast %6 : vector<16x1xf32> to vector<16x32xf32>
    %8 = arith.subf %2, %7 : vector<16x32xf32>
    %9 = arith.mulf %8, %8 : vector<16x32xf32>
    %cst_4 = arith.constant dense<0.000000e+00> : vector<16xf32>
    %10 = vector.multi_reduction <add>, %9, %cst_4 [1] : vector<16x32xf32> to vector<16xf32>
    %11 = vector.shape_cast %10 : vector<16xf32> to vector<16x1xf32>
    %cst_5 = arith.constant 3.200000e+01 : f32
    %12 = vector.broadcast %cst_5 : f32 to vector<16x1xf32>
    %13 = arith.divf %11, %12 : vector<16x1xf32>
    %14 = vector.broadcast %6 : vector<16x1xf32> to vector<16x32xf32>
    %15 = arith.subf %2, %14 : vector<16x32xf32>
    %cst_6 = arith.constant 9.99999974E-6 : f32
    %16 = vector.broadcast %cst_6 : f32 to vector<16x1xf32>
    %17 = arith.addf %13, %16 : vector<16x1xf32>
    %18 = math.rsqrt %17 : vector<16x1xf32>
    %19 = vector.broadcast %18 : vector<16x1xf32> to vector<16x32xf32>
    %20 = arith.mulf %15, %19 : vector<16x32xf32>
    %c0_7 = arith.constant 0 : index
    %c0_8 = arith.constant 0 : index
    %21 = vector.load %arg3[%c0_7, %c0_8] : memref<1x32xf32, #tpu.memory_space<vmem>>, vector<1x32xf32>
    %22 = vector.broadcast %21 : vector<1x32xf32> to vector<16x32xf32>
    %23 = arith.mulf %20, %22 : vector<16x32xf32>
    %c0_9 = arith.constant 0 : index
    %c0_10 = arith.constant 0 : index
    %24 = vector.load %arg4[%c0_9, %c0_10] : memref<1x32xf32, #tpu.memory_space<vmem>>, vector<1x32xf32>
    %25 = vector.broadcast %24 : vector<1x32xf32> to vector<16x32xf32>
    %26 = arith.addf %23, %25 : vector<16x32xf32>
    %c0_11 = arith.constant 0 : index
    %c0_12 = arith.constant 0 : index
    %27 = vector.load %arg5[%c0_11, %c0_12] : memref<16x32xf32, #tpu.memory_space<vmem>>, vector<16x32xf32>
    tpu.vector_store %arg5[%c0_11, %c0_12], %26 {strides = array<i32>} : memref<16x32xf32, #tpu.memory_space<vmem>>, vector<16x32xf32>,
    return
  }
  func.func @transform_0(%arg0: i32) -> (i32, i32) {
    %c0_i32 = arith.constant 0 : i32
    %c0_i32_0 = arith.constant 0 : i32
    return %arg0, %c0_i32 : i32, i32
  }
  func.func @transform_1(%arg0: i32) -> (i32, i32) {
    %c0_i32 = arith.constant 0 : i32
    %c0_i32_0 = arith.constant 0 : i32
    return %arg0, %c0_i32 : i32, i32
  }
  func.func @transform_2(%arg0: i32) -> (i32, i32) {
    %c0_i32 = arith.constant 0 : i32
    %c0_i32_0 = arith.constant 0 : i32
    %c0_i32_1 = arith.constant 0 : i32
    return %c0_i32, %c0_i32_0 : i32, i32
  }
  func.func @transform_3(%arg0: i32) -> (i32, i32) {
    %c0_i32 = arith.constant 0 : i32
    %c0_i32_0 = arith.constant 0 : i32
    %c0_i32_1 = arith.constant 0 : i32
    return %c0_i32, %c0_i32_0 : i32, i32
  }
  func.func @transform_4(%arg0: i32) -> (i32, i32) {
    %c0_i32 = arith.constant 0 : i32
    %c0_i32_0 = arith.constant 0 : i32
    return %arg0, %c0_i32 : i32, i32
  }
}

module attributes {stable_mosaic.version = 11 : i64} {
  func.func @_self_attn_kernel(%arg0: i32, %arg1: memref<1x8x32xf32, #tpu.memory_space<vmem>>, %arg2: memref<1x8x32xf32, #tpu.memory_space<vmem>>, %arg3: memref<1x8x32xf32, #tpu.memory_space<vmem>>, %arg4: memref<8x8xf32, #tpu.memory_space<vmem>>, %arg5: memref<1x1x8xf32, #tpu.memory_space<vmem>>, %arg6: memref<1x8x32xf32, #tpu.memory_space<vmem>>) attributes {dimension_semantics = [#tpu.dimension_semantics<parallel>], iteration_bounds = array<i64: 2>, scalar_prefetch = 0 : i64, scratch_operands = 0 : i64, tpu.core_type = #tpu.core_type<tc>, window_params = [{transform_indices = @transform_0, window_bounds = array<i64: 1, 8, 32>}, {transform_indices = @transform_1, window_bounds = array<i64: 1, 8, 32>}, {transform_indices = @transform_2, window_bounds = array<i64: 1, 8, 32>}, {pipeline_mode = #tpu.pipeline_mode<synchronous>, transform_indices = @transform_3, window_bounds = array<i64: 8, 8>}, {transform_indices = @transform_4, window_bounds = array<i64: 1, 1, 8>}, {transform_indices = @transform_5, window_bounds = array<i64: 1, 8, 32>}]} {
    %c0 = arith.constant 0 : index
    %c0_0 = arith.constant 0 : index
    %c0_1 = arith.constant 0 : index
    %0 = vector.load %arg1[%c0, %c0_0, %c0_1] : memref<1x8x32xf32, #tpu.memory_space<vmem>>, vector<1x8x32xf32>
    %1 = vector.shape_cast %0 : vector<1x8x32xf32> to vector<8x32xf32>
    %c0_2 = arith.constant 0 : index
    %c0_3 = arith.constant 0 : index
    %c0_4 = arith.constant 0 : index
    %2 = vector.load %arg2[%c0_2, %c0_3, %c0_4] : memref<1x8x32xf32, #tpu.memory_space<vmem>>, vector<1x8x32xf32>
    %3 = vector.shape_cast %2 : vector<1x8x32xf32> to vector<8x32xf32>
    %c0_5 = arith.constant 0 : index
    %c0_6 = arith.constant 0 : index
    %c0_7 = arith.constant 0 : index
    %4 = vector.load %arg3[%c0_5, %c0_6, %c0_7] : memref<1x8x32xf32, #tpu.memory_space<vmem>>, vector<1x8x32xf32>
    %5 = vector.shape_cast %4 : vector<1x8x32xf32> to vector<8x32xf32>
    %c0_8 = arith.constant 0 : index
    %c0_9 = arith.constant 0 : index
    %6 = vector.load %arg4[%c0_8, %c0_9] : memref<8x8xf32, #tpu.memory_space<vmem>>, vector<8x8xf32>
    %c0_10 = arith.constant 0 : index
    %c0_11 = arith.constant 0 : index
    %c0_12 = arith.constant 0 : index
    %7 = vector.load %arg5[%c0_10, %c0_11, %c0_12] : memref<1x1x8xf32, #tpu.memory_space<vmem>>, vector<1x1x8xf32>
    %8 = vector.shape_cast %7 : vector<1x1x8xf32> to vector<1x8xf32>
    %9 = vector.broadcast %8 : vector<1x8xf32> to vector<8x8xf32>
    %10 = arith.addf %6, %9 : vector<8x8xf32>
    %11 = vector.extract_strided_slice %1 {offsets = [0, 0], sizes = [8, 8], strides = [1, 1]} : vector<8x32xf32> to vector<8x8xf32>
    %12 = vector.extract_strided_slice %3 {offsets = [0, 0], sizes = [8, 8], strides = [1, 1]} : vector<8x32xf32> to vector<8x8xf32>
    %13 = vector.extract_strided_slice %5 {offsets = [0, 0], sizes = [8, 8], strides = [1, 1]} : vector<8x32xf32> to vector<8x8xf32>
    %cst = arith.constant dense<0.000000e+00> : vector<8x8xf32>
    %14 = tpu.matmul %11, %12, %cst {dimension_numbers = #tpu.dot_dimension_numbers<[1], [1], [0], [0], [0, 0, 1, 0], [], []>} : vector<8x8xf32>, vector<8x8xf32>, vector<8x8xf32> -> vector<8x8xf32>
    %cst_13 = arith.constant 0.353553385 : f32
    %15 = vector.broadcast %cst_13 : f32 to vector<8x8xf32>
    %16 = arith.mulf %14, %15 : vector<8x8xf32>
    %17 = arith.addf %16, %10 : vector<8x8xf32>
    %cst_14 = arith.constant dense<0xFF800000> : vector<8xf32>
    %18 = vector.multi_reduction <maximumf>, %17, %cst_14 [1] : vector<8x8xf32> to vector<8xf32>
    %19 = vector.shape_cast %18 : vector<8xf32> to vector<8x1xf32>
    %20 = vector.broadcast %19 : vector<8x1xf32> to vector<8x8xf32>
    %21 = arith.subf %17, %20 : vector<8x8xf32>
    %22 = math.exp %21 : vector<8x8xf32>
    %cst_15 = arith.constant dense<0.000000e+00> : vector<8xf32>
    %23 = vector.multi_reduction <add>, %22, %cst_15 [1] : vector<8x8xf32> to vector<8xf32>
    %24 = vector.shape_cast %23 : vector<8xf32> to vector<8x1xf32>
    %25 = tpu.reciprocal %24 {approx = true} : vector<8x1xf32> -> vector<8x1xf32>
    %26 = vector.broadcast %25 : vector<8x1xf32> to vector<8x8xf32>
    %27 = arith.mulf %22, %26 : vector<8x8xf32>
    %cst_16 = arith.constant dense<0.000000e+00> : vector<8x8xf32>
    %28 = tpu.matmul %27, %13, %cst_16 {dimension_numbers = #tpu.dot_dimension_numbers<[1], [0], [0], [1], [0, 0, 1, 1], [], []>} : vector<8x8xf32>, vector<8x8xf32>, vector<8x8xf32> -> vector<8x8xf32>
    %29 = vector.extract_strided_slice %1 {offsets = [0, 8], sizes = [8, 8], strides = [1, 1]} : vector<8x32xf32> to vector<8x8xf32>
    %30 = vector.extract_strided_slice %3 {offsets = [0, 8], sizes = [8, 8], strides = [1, 1]} : vector<8x32xf32> to vector<8x8xf32>
    %31 = vector.extract_strided_slice %5 {offsets = [0, 8], sizes = [8, 8], strides = [1, 1]} : vector<8x32xf32> to vector<8x8xf32>
    %cst_17 = arith.constant dense<0.000000e+00> : vector<8x8xf32>
    %32 = tpu.matmul %29, %30, %cst_17 {dimension_numbers = #tpu.dot_dimension_numbers<[1], [1], [0], [0], [0, 0, 1, 0], [], []>} : vector<8x8xf32>, vector<8x8xf32>, vector<8x8xf32> -> vector<8x8xf32>
    %cst_18 = arith.constant 0.353553385 : f32
    %33 = vector.broadcast %cst_18 : f32 to vector<8x8xf32>
    %34 = arith.mulf %32, %33 : vector<8x8xf32>
    %35 = arith.addf %34, %10 : vector<8x8xf32>
    %cst_19 = arith.constant dense<0xFF800000> : vector<8xf32>
    %36 = vector.multi_reduction <maximumf>, %35, %cst_19 [1] : vector<8x8xf32> to vector<8xf32>
    %37 = vector.shape_cast %36 : vector<8xf32> to vector<8x1xf32>
    %38 = vector.broadcast %37 : vector<8x1xf32> to vector<8x8xf32>
    %39 = arith.subf %35, %38 : vector<8x8xf32>
    %40 = math.exp %39 : vector<8x8xf32>
    %cst_20 = arith.constant dense<0.000000e+00> : vector<8xf32>
    %41 = vector.multi_reduction <add>, %40, %cst_20 [1] : vector<8x8xf32> to vector<8xf32>
    %42 = vector.shape_cast %41 : vector<8xf32> to vector<8x1xf32>
    %43 = tpu.reciprocal %42 {approx = true} : vector<8x1xf32> -> vector<8x1xf32>
    %44 = vector.broadcast %43 : vector<8x1xf32> to vector<8x8xf32>
    %45 = arith.mulf %40, %44 : vector<8x8xf32>
    %cst_21 = arith.constant dense<0.000000e+00> : vector<8x8xf32>
    %46 = tpu.matmul %45, %31, %cst_21 {dimension_numbers = #tpu.dot_dimension_numbers<[1], [0], [0], [1], [0, 0, 1, 1], [], []>} : vector<8x8xf32>, vector<8x8xf32>, vector<8x8xf32> -> vector<8x8xf32>
    %47 = vector.extract_strided_slice %1 {offsets = [0, 16], sizes = [8, 8], strides = [1, 1]} : vector<8x32xf32> to vector<8x8xf32>
    %48 = vector.extract_strided_slice %3 {offsets = [0, 16], sizes = [8, 8], strides = [1, 1]} : vector<8x32xf32> to vector<8x8xf32>
    %49 = vector.extract_strided_slice %5 {offsets = [0, 16], sizes = [8, 8], strides = [1, 1]} : vector<8x32xf32> to vector<8x8xf32>
    %cst_22 = arith.constant dense<0.000000e+00> : vector<8x8xf32>
    %50 = tpu.matmul %47, %48, %cst_22 {dimension_numbers = #tpu.dot_dimension_numbers<[1], [1], [0], [0], [0, 0, 1, 0], [], []>} : vector<8x8xf32>, vector<8x8xf32>, vector<8x8xf32> -> vector<8x8xf32>
    %cst_23 = arith.constant 0.353553385 : f32
    %51 = vector.broadcast %cst_23 : f32 to vector<8x8xf32>
    %52 = arith.mulf %50, %51 : vector<8x8xf32>
    %53 = arith.addf %52, %10 : vector<8x8xf32>
    %cst_24 = arith.constant dense<0xFF800000> : vector<8xf32>
    %54 = vector.multi_reduction <maximumf>, %53, %cst_24 [1] : vector<8x8xf32> to vector<8xf32>
    %55 = vector.shape_cast %54 : vector<8xf32> to vector<8x1xf32>
    %56 = vector.broadcast %55 : vector<8x1xf32> to vector<8x8xf32>
    %57 = arith.subf %53, %56 : vector<8x8xf32>
    %58 = math.exp %57 : vector<8x8xf32>
    %cst_25 = arith.constant dense<0.000000e+00> : vector<8xf32>
    %59 = vector.multi_reduction <add>, %58, %cst_25 [1] : vector<8x8xf32> to vector<8xf32>
    %60 = vector.shape_cast %59 : vector<8xf32> to vector<8x1xf32>
    %61 = tpu.reciprocal %60 {approx = true} : vector<8x1xf32> -> vector<8x1xf32>
    %62 = vector.broadcast %61 : vector<8x1xf32> to vector<8x8xf32>
    %63 = arith.mulf %58, %62 : vector<8x8xf32>
    %cst_26 = arith.constant dense<0.000000e+00> : vector<8x8xf32>
    %64 = tpu.matmul %63, %49, %cst_26 {dimension_numbers = #tpu.dot_dimension_numbers<[1], [0], [0], [1], [0, 0, 1, 1], [], []>} : vector<8x8xf32>, vector<8x8xf32>, vector<8x8xf32> -> vector<8x8xf32>
    %65 = vector.extract_strided_slice %1 {offsets = [0, 24], sizes = [8, 8], strides = [1, 1]} : vector<8x32xf32> to vector<8x8xf32>
    %66 = vector.extract_strided_slice %3 {offsets = [0, 24], sizes = [8, 8], strides = [1, 1]} : vector<8x32xf32> to vector<8x8xf32>
    %67 = vector.extract_strided_slice %5 {offsets = [0, 24], sizes = [8, 8], strides = [1, 1]} : vector<8x32xf32> to vector<8x8xf32>
    %cst_27 = arith.constant dense<0.000000e+00> : vector<8x8xf32>
    %68 = tpu.matmul %65, %66, %cst_27 {dimension_numbers = #tpu.dot_dimension_numbers<[1], [1], [0], [0], [0, 0, 1, 0], [], []>} : vector<8x8xf32>, vector<8x8xf32>, vector<8x8xf32> -> vector<8x8xf32>
    %cst_28 = arith.constant 0.353553385 : f32
    %69 = vector.broadcast %cst_28 : f32 to vector<8x8xf32>
    %70 = arith.mulf %68, %69 : vector<8x8xf32>
    %71 = arith.addf %70, %10 : vector<8x8xf32>
    %cst_29 = arith.constant dense<0xFF800000> : vector<8xf32>
    %72 = vector.multi_reduction <maximumf>, %71, %cst_29 [1] : vector<8x8xf32> to vector<8xf32>
    %73 = vector.shape_cast %72 : vector<8xf32> to vector<8x1xf32>
    %74 = vector.broadcast %73 : vector<8x1xf32> to vector<8x8xf32>
    %75 = arith.subf %71, %74 : vector<8x8xf32>
    %76 = math.exp %75 : vector<8x8xf32>
    %cst_30 = arith.constant dense<0.000000e+00> : vector<8xf32>
    %77 = vector.multi_reduction <add>, %76, %cst_30 [1] : vector<8x8xf32> to vector<8xf32>
    %78 = vector.shape_cast %77 : vector<8xf32> to vector<8x1xf32>
    %79 = tpu.reciprocal %78 {approx = true} : vector<8x1xf32> -> vector<8x1xf32>
    %80 = vector.broadcast %79 : vector<8x1xf32> to vector<8x8xf32>
    %81 = arith.mulf %76, %80 : vector<8x8xf32>
    %cst_31 = arith.constant dense<0.000000e+00> : vector<8x8xf32>
    %82 = tpu.matmul %81, %67, %cst_31 {dimension_numbers = #tpu.dot_dimension_numbers<[1], [0], [0], [1], [0, 0, 1, 1], [], []>} : vector<8x8xf32>, vector<8x8xf32>, vector<8x8xf32> -> vector<8x8xf32>
    %83 = tpu.concatenate %28, %46, %64, %82 in 1 : vector<8x8xf32>, vector<8x8xf32>, vector<8x8xf32>, vector<8x8xf32> -> vector<8x32xf32>
    %c0_32 = arith.constant 0 : index
    %c0_33 = arith.constant 0 : index
    %c0_34 = arith.constant 0 : index
    %84 = vector.load %arg6[%c0_32, %c0_33, %c0_34] : memref<1x8x32xf32, #tpu.memory_space<vmem>>, vector<1x8x32xf32>
    %85 = vector.shape_cast %84 : vector<1x8x32xf32> to vector<8x32xf32>
    %86 = vector.shape_cast %83 : vector<8x32xf32> to vector<1x8x32xf32>
    tpu.vector_store %arg6[%c0_32, %c0_33, %c0_34], %86 {strides = array<i32>} : memref<1x8x32xf32, #tpu.memory_space<vmem>>, vector<1x8x32xf32>,
    return
  }
  func.func @transform_0(%arg0: i32) -> (i32, i32, i32) {
    %c0_i32 = arith.constant 0 : i32
    %c0_i32_0 = arith.constant 0 : i32
    %c0_i32_1 = arith.constant 0 : i32
    return %arg0, %c0_i32, %c0_i32_0 : i32, i32, i32
  }
  func.func @transform_1(%arg0: i32) -> (i32, i32, i32) {
    %c0_i32 = arith.constant 0 : i32
    %c0_i32_0 = arith.constant 0 : i32
    %c0_i32_1 = arith.constant 0 : i32
    return %arg0, %c0_i32, %c0_i32_0 : i32, i32, i32
  }
  func.func @transform_2(%arg0: i32) -> (i32, i32, i32) {
    %c0_i32 = arith.constant 0 : i32
    %c0_i32_0 = arith.constant 0 : i32
    %c0_i32_1 = arith.constant 0 : i32
    return %arg0, %c0_i32, %c0_i32_0 : i32, i32, i32
  }
  func.func @transform_3(%arg0: i32) -> (i32, i32) {
    %c0_i32 = arith.constant 0 : i32
    %c0_i32_0 = arith.constant 0 : i32
    %c0_i32_1 = arith.constant 0 : i32
    return %c0_i32, %c0_i32_0 : i32, i32
  }
  func.func @transform_4(%arg0: i32) -> (i32, i32, i32) {
    %c0_i32 = arith.constant 0 : i32
    %c0_i32_0 = arith.constant 0 : i32
    %c0_i32_1 = arith.constant 0 : i32
    return %arg0, %c0_i32, %c0_i32_0 : i32, i32, i32
  }
  func.func @transform_5(%arg0: i32) -> (i32, i32, i32) {
    %c0_i32 = arith.constant 0 : i32
    %c0_i32_0 = arith.constant 0 : i32
    %c0_i32_1 = arith.constant 0 : i32
    return %arg0, %c0_i32, %c0_i32_0 : i32, i32, i32
  }
}

module attributes {stable_mosaic.version = 11 : i64} {
  func.func @_cross_attn_kernel(%arg0: i32, %arg1: memref<1x8x32xf32, #tpu.memory_space<vmem>>, %arg2: memref<1x8x32xf32, #tpu.memory_space<vmem>>, %arg3: memref<1x8x32xf32, #tpu.memory_space<vmem>>, %arg4: memref<1x8x32xf32, #tpu.memory_space<vmem>>, %arg5: memref<1x4x8x8xf32, #tpu.memory_space<vmem>>) attributes {dimension_semantics = [#tpu.dimension_semantics<parallel>], iteration_bounds = array<i64: 2>, scalar_prefetch = 0 : i64, scratch_operands = 0 : i64, tpu.core_type = #tpu.core_type<tc>, window_params = [{transform_indices = @transform_0, window_bounds = array<i64: 1, 8, 32>}, {transform_indices = @transform_1, window_bounds = array<i64: 1, 8, 32>}, {transform_indices = @transform_2, window_bounds = array<i64: 1, 8, 32>}, {transform_indices = @transform_3, window_bounds = array<i64: 1, 8, 32>}, {transform_indices = @transform_4, window_bounds = array<i64: 1, 4, 8, 8>}]} {
    %c0 = arith.constant 0 : index
    %c0_0 = arith.constant 0 : index
    %c0_1 = arith.constant 0 : index
    %0 = vector.load %arg1[%c0, %c0_0, %c0_1] : memref<1x8x32xf32, #tpu.memory_space<vmem>>, vector<1x8x32xf32>
    %1 = vector.shape_cast %0 : vector<1x8x32xf32> to vector<8x32xf32>
    %c0_2 = arith.constant 0 : index
    %c0_3 = arith.constant 0 : index
    %c0_4 = arith.constant 0 : index
    %2 = vector.load %arg2[%c0_2, %c0_3, %c0_4] : memref<1x8x32xf32, #tpu.memory_space<vmem>>, vector<1x8x32xf32>
    %3 = vector.shape_cast %2 : vector<1x8x32xf32> to vector<8x32xf32>
    %c0_5 = arith.constant 0 : index
    %c0_6 = arith.constant 0 : index
    %c0_7 = arith.constant 0 : index
    %4 = vector.load %arg3[%c0_5, %c0_6, %c0_7] : memref<1x8x32xf32, #tpu.memory_space<vmem>>, vector<1x8x32xf32>
    %5 = vector.shape_cast %4 : vector<1x8x32xf32> to vector<8x32xf32>
    %6 = vector.extract_strided_slice %1 {offsets = [0, 0], sizes = [8, 8], strides = [1, 1]} : vector<8x32xf32> to vector<8x8xf32>
    %7 = vector.extract_strided_slice %3 {offsets = [0, 0], sizes = [8, 8], strides = [1, 1]} : vector<8x32xf32> to vector<8x8xf32>
    %cst = arith.constant dense<0.000000e+00> : vector<8x8xf32>
    %8 = tpu.matmul %6, %7, %cst {dimension_numbers = #tpu.dot_dimension_numbers<[1], [1], [0], [0], [0, 0, 1, 0], [], []>} : vector<8x8xf32>, vector<8x8xf32>, vector<8x8xf32> -> vector<8x8xf32>
    %cst_8 = arith.constant 0.353553385 : f32
    %9 = vector.broadcast %cst_8 : f32 to vector<8x8xf32>
    %10 = arith.mulf %8, %9 : vector<8x8xf32>
    %cst_9 = arith.constant dense<0xFF800000> : vector<8xf32>
    %11 = vector.multi_reduction <maximumf>, %10, %cst_9 [1] : vector<8x8xf32> to vector<8xf32>
    %12 = vector.shape_cast %11 : vector<8xf32> to vector<8x1xf32>
    %13 = vector.broadcast %12 : vector<8x1xf32> to vector<8x8xf32>
    %14 = arith.subf %10, %13 : vector<8x8xf32>
    %15 = math.exp %14 : vector<8x8xf32>
    %cst_10 = arith.constant dense<0.000000e+00> : vector<8xf32>
    %16 = vector.multi_reduction <add>, %15, %cst_10 [1] : vector<8x8xf32> to vector<8xf32>
    %17 = vector.shape_cast %16 : vector<8xf32> to vector<8x1xf32>
    %18 = tpu.reciprocal %17 {approx = true} : vector<8x1xf32> -> vector<8x1xf32>
    %19 = vector.broadcast %18 : vector<8x1xf32> to vector<8x8xf32>
    %20 = arith.mulf %15, %19 : vector<8x8xf32>
    %c0_11 = arith.constant 0 : index
    %c0_12 = arith.constant 0 : index
    %c0_13 = arith.constant 0 : index
    %c0_14 = arith.constant 0 : index
    %21 = vector.load %arg5[%c0_11, %c0_12, %c0_13, %c0_14] : memref<1x4x8x8xf32, #tpu.memory_space<vmem>>, vector<1x1x8x8xf32>
    %22 = vector.shape_cast %21 : vector<1x1x8x8xf32> to vector<8x8xf32>
    %23 = vector.shape_cast %20 : vector<8x8xf32> to vector<1x1x8x8xf32>
    tpu.vector_store %arg5[%c0_11, %c0_12, %c0_13, %c0_14], %23 {strides = array<i32>} : memref<1x4x8x8xf32, #tpu.memory_space<vmem>>, vector<1x1x8x8xf32>,
    %24 = vector.extract_strided_slice %5 {offsets = [0, 0], sizes = [8, 8], strides = [1, 1]} : vector<8x32xf32> to vector<8x8xf32>
    %cst_15 = arith.constant dense<0.000000e+00> : vector<8x8xf32>
    %25 = tpu.matmul %20, %24, %cst_15 {dimension_numbers = #tpu.dot_dimension_numbers<[1], [0], [0], [1], [0, 0, 1, 1], [], []>} : vector<8x8xf32>, vector<8x8xf32>, vector<8x8xf32> -> vector<8x8xf32>
    %26 = vector.extract_strided_slice %1 {offsets = [0, 8], sizes = [8, 8], strides = [1, 1]} : vector<8x32xf32> to vector<8x8xf32>
    %27 = vector.extract_strided_slice %3 {offsets = [0, 8], sizes = [8, 8], strides = [1, 1]} : vector<8x32xf32> to vector<8x8xf32>
    %cst_16 = arith.constant dense<0.000000e+00> : vector<8x8xf32>
    %28 = tpu.matmul %26, %27, %cst_16 {dimension_numbers = #tpu.dot_dimension_numbers<[1], [1], [0], [0], [0, 0, 1, 0], [], []>} : vector<8x8xf32>, vector<8x8xf32>, vector<8x8xf32> -> vector<8x8xf32>
    %cst_17 = arith.constant 0.353553385 : f32
    %29 = vector.broadcast %cst_17 : f32 to vector<8x8xf32>
    %30 = arith.mulf %28, %29 : vector<8x8xf32>
    %cst_18 = arith.constant dense<0xFF800000> : vector<8xf32>
    %31 = vector.multi_reduction <maximumf>, %30, %cst_18 [1] : vector<8x8xf32> to vector<8xf32>
    %32 = vector.shape_cast %31 : vector<8xf32> to vector<8x1xf32>
    %33 = vector.broadcast %32 : vector<8x1xf32> to vector<8x8xf32>
    %34 = arith.subf %30, %33 : vector<8x8xf32>
    %35 = math.exp %34 : vector<8x8xf32>
    %cst_19 = arith.constant dense<0.000000e+00> : vector<8xf32>
    %36 = vector.multi_reduction <add>, %35, %cst_19 [1] : vector<8x8xf32> to vector<8xf32>
    %37 = vector.shape_cast %36 : vector<8xf32> to vector<8x1xf32>
    %38 = tpu.reciprocal %37 {approx = true} : vector<8x1xf32> -> vector<8x1xf32>
    %39 = vector.broadcast %38 : vector<8x1xf32> to vector<8x8xf32>
    %40 = arith.mulf %35, %39 : vector<8x8xf32>
    %c0_20 = arith.constant 0 : index
    %c1 = arith.constant 1 : index
    %c0_21 = arith.constant 0 : index
    %c0_22 = arith.constant 0 : index
    %41 = vector.load %arg5[%c0_20, %c1, %c0_21, %c0_22] : memref<1x4x8x8xf32, #tpu.memory_space<vmem>>, vector<1x1x8x8xf32>
    %42 = vector.shape_cast %41 : vector<1x1x8x8xf32> to vector<8x8xf32>
    %43 = vector.shape_cast %40 : vector<8x8xf32> to vector<1x1x8x8xf32>
    tpu.vector_store %arg5[%c0_20, %c1, %c0_21, %c0_22], %43 {strides = array<i32>} : memref<1x4x8x8xf32, #tpu.memory_space<vmem>>, vector<1x1x8x8xf32>,
    %44 = vector.extract_strided_slice %5 {offsets = [0, 8], sizes = [8, 8], strides = [1, 1]} : vector<8x32xf32> to vector<8x8xf32>
    %cst_23 = arith.constant dense<0.000000e+00> : vector<8x8xf32>
    %45 = tpu.matmul %40, %44, %cst_23 {dimension_numbers = #tpu.dot_dimension_numbers<[1], [0], [0], [1], [0, 0, 1, 1], [], []>} : vector<8x8xf32>, vector<8x8xf32>, vector<8x8xf32> -> vector<8x8xf32>
    %46 = vector.extract_strided_slice %1 {offsets = [0, 16], sizes = [8, 8], strides = [1, 1]} : vector<8x32xf32> to vector<8x8xf32>
    %47 = vector.extract_strided_slice %3 {offsets = [0, 16], sizes = [8, 8], strides = [1, 1]} : vector<8x32xf32> to vector<8x8xf32>
    %cst_24 = arith.constant dense<0.000000e+00> : vector<8x8xf32>
    %48 = tpu.matmul %46, %47, %cst_24 {dimension_numbers = #tpu.dot_dimension_numbers<[1], [1], [0], [0], [0, 0, 1, 0], [], []>} : vector<8x8xf32>, vector<8x8xf32>, vector<8x8xf32> -> vector<8x8xf32>
    %cst_25 = arith.constant 0.353553385 : f32
    %49 = vector.broadcast %cst_25 : f32 to vector<8x8xf32>
    %50 = arith.mulf %48, %49 : vector<8x8xf32>
    %cst_26 = arith.constant dense<0xFF800000> : vector<8xf32>
    %51 = vector.multi_reduction <maximumf>, %50, %cst_26 [1] : vector<8x8xf32> to vector<8xf32>
    %52 = vector.shape_cast %51 : vector<8xf32> to vector<8x1xf32>
    %53 = vector.broadcast %52 : vector<8x1xf32> to vector<8x8xf32>
    %54 = arith.subf %50, %53 : vector<8x8xf32>
    %55 = math.exp %54 : vector<8x8xf32>
    %cst_27 = arith.constant dense<0.000000e+00> : vector<8xf32>
    %56 = vector.multi_reduction <add>, %55, %cst_27 [1] : vector<8x8xf32> to vector<8xf32>
    %57 = vector.shape_cast %56 : vector<8xf32> to vector<8x1xf32>
    %58 = tpu.reciprocal %57 {approx = true} : vector<8x1xf32> -> vector<8x1xf32>
    %59 = vector.broadcast %58 : vector<8x1xf32> to vector<8x8xf32>
    %60 = arith.mulf %55, %59 : vector<8x8xf32>
    %c0_28 = arith.constant 0 : index
    %c2 = arith.constant 2 : index
    %c0_29 = arith.constant 0 : index
    %c0_30 = arith.constant 0 : index
    %61 = vector.load %arg5[%c0_28, %c2, %c0_29, %c0_30] : memref<1x4x8x8xf32, #tpu.memory_space<vmem>>, vector<1x1x8x8xf32>
    %62 = vector.shape_cast %61 : vector<1x1x8x8xf32> to vector<8x8xf32>
    %63 = vector.shape_cast %60 : vector<8x8xf32> to vector<1x1x8x8xf32>
    tpu.vector_store %arg5[%c0_28, %c2, %c0_29, %c0_30], %63 {strides = array<i32>} : memref<1x4x8x8xf32, #tpu.memory_space<vmem>>, vector<1x1x8x8xf32>,
    %64 = vector.extract_strided_slice %5 {offsets = [0, 16], sizes = [8, 8], strides = [1, 1]} : vector<8x32xf32> to vector<8x8xf32>
    %cst_31 = arith.constant dense<0.000000e+00> : vector<8x8xf32>
    %65 = tpu.matmul %60, %64, %cst_31 {dimension_numbers = #tpu.dot_dimension_numbers<[1], [0], [0], [1], [0, 0, 1, 1], [], []>} : vector<8x8xf32>, vector<8x8xf32>, vector<8x8xf32> -> vector<8x8xf32>
    %66 = vector.extract_strided_slice %1 {offsets = [0, 24], sizes = [8, 8], strides = [1, 1]} : vector<8x32xf32> to vector<8x8xf32>
    %67 = vector.extract_strided_slice %3 {offsets = [0, 24], sizes = [8, 8], strides = [1, 1]} : vector<8x32xf32> to vector<8x8xf32>
    %cst_32 = arith.constant dense<0.000000e+00> : vector<8x8xf32>
    %68 = tpu.matmul %66, %67, %cst_32 {dimension_numbers = #tpu.dot_dimension_numbers<[1], [1], [0], [0], [0, 0, 1, 0], [], []>} : vector<8x8xf32>, vector<8x8xf32>, vector<8x8xf32> -> vector<8x8xf32>
    %cst_33 = arith.constant 0.353553385 : f32
    %69 = vector.broadcast %cst_33 : f32 to vector<8x8xf32>
    %70 = arith.mulf %68, %69 : vector<8x8xf32>
    %cst_34 = arith.constant dense<0xFF800000> : vector<8xf32>
    %71 = vector.multi_reduction <maximumf>, %70, %cst_34 [1] : vector<8x8xf32> to vector<8xf32>
    %72 = vector.shape_cast %71 : vector<8xf32> to vector<8x1xf32>
    %73 = vector.broadcast %72 : vector<8x1xf32> to vector<8x8xf32>
    %74 = arith.subf %70, %73 : vector<8x8xf32>
    %75 = math.exp %74 : vector<8x8xf32>
    %cst_35 = arith.constant dense<0.000000e+00> : vector<8xf32>
    %76 = vector.multi_reduction <add>, %75, %cst_35 [1] : vector<8x8xf32> to vector<8xf32>
    %77 = vector.shape_cast %76 : vector<8xf32> to vector<8x1xf32>
    %78 = tpu.reciprocal %77 {approx = true} : vector<8x1xf32> -> vector<8x1xf32>
    %79 = vector.broadcast %78 : vector<8x1xf32> to vector<8x8xf32>
    %80 = arith.mulf %75, %79 : vector<8x8xf32>
    %c0_36 = arith.constant 0 : index
    %c3 = arith.constant 3 : index
    %c0_37 = arith.constant 0 : index
    %c0_38 = arith.constant 0 : index
    %81 = vector.load %arg5[%c0_36, %c3, %c0_37, %c0_38] : memref<1x4x8x8xf32, #tpu.memory_space<vmem>>, vector<1x1x8x8xf32>
    %82 = vector.shape_cast %81 : vector<1x1x8x8xf32> to vector<8x8xf32>
    %83 = vector.shape_cast %80 : vector<8x8xf32> to vector<1x1x8x8xf32>
    tpu.vector_store %arg5[%c0_36, %c3, %c0_37, %c0_38], %83 {strides = array<i32>} : memref<1x4x8x8xf32, #tpu.memory_space<vmem>>, vector<1x1x8x8xf32>,
    %84 = vector.extract_strided_slice %5 {offsets = [0, 24], sizes = [8, 8], strides = [1, 1]} : vector<8x32xf32> to vector<8x8xf32>
    %cst_39 = arith.constant dense<0.000000e+00> : vector<8x8xf32>
    %85 = tpu.matmul %80, %84, %cst_39 {dimension_numbers = #tpu.dot_dimension_numbers<[1], [0], [0], [1], [0, 0, 1, 1], [], []>} : vector<8x8xf32>, vector<8x8xf32>, vector<8x8xf32> -> vector<8x8xf32>
    %86 = tpu.concatenate %25, %45, %65, %85 in 1 : vector<8x8xf32>, vector<8x8xf32>, vector<8x8xf32>, vector<8x8xf32> -> vector<8x32xf32>
    %c0_40 = arith.constant 0 : index
    %c0_41 = arith.constant 0 : index
    %c0_42 = arith.constant 0 : index
    %87 = vector.load %arg4[%c0_40, %c0_41, %c0_42] : memref<1x8x32xf32, #tpu.memory_space<vmem>>, vector<1x8x32xf32>
    %88 = vector.shape_cast %87 : vector<1x8x32xf32> to vector<8x32xf32>
    %89 = vector.shape_cast %86 : vector<8x32xf32> to vector<1x8x32xf32>
    tpu.vector_store %arg4[%c0_40, %c0_41, %c0_42], %89 {strides = array<i32>} : memref<1x8x32xf32, #tpu.memory_space<vmem>>, vector<1x8x32xf32>,
    return
  }
  func.func @transform_0(%arg0: i32) -> (i32, i32, i32) {
    %c0_i32 = arith.constant 0 : i32
    %c0_i32_0 = arith.constant 0 : i32
    %c0_i32_1 = arith.constant 0 : i32
    return %arg0, %c0_i32, %c0_i32_0 : i32, i32, i32
  }
  func.func @transform_1(%arg0: i32) -> (i32, i32, i32) {
    %c0_i32 = arith.constant 0 : i32
    %c0_i32_0 = arith.constant 0 : i32
    %c0_i32_1 = arith.constant 0 : i32
    return %arg0, %c0_i32, %c0_i32_0 : i32, i32, i32
  }
  func.func @transform_2(%arg0: i32) -> (i32, i32, i32) {
    %c0_i32 = arith.constant 0 : i32
    %c0_i32_0 = arith.constant 0 : i32
    %c0_i32_1 = arith.constant 0 : i32
    return %arg0, %c0_i32, %c0_i32_0 : i32, i32, i32
  }
  func.func @transform_3(%arg0: i32) -> (i32, i32, i32) {
    %c0_i32 = arith.constant 0 : i32
    %c0_i32_0 = arith.constant 0 : i32
    %c0_i32_1 = arith.constant 0 : i32
    return %arg0, %c0_i32, %c0_i32_0 : i32, i32, i32
  }
  func.func @transform_4(%arg0: i32) -> (i32, i32, i32, i32) {
    %c0_i32 = arith.constant 0 : i32
    %c0_i32_0 = arith.constant 0 : i32
    %c0_i32_1 = arith.constant 0 : i32
    %c0_i32_2 = arith.constant 0 : i32
    return %arg0, %c0_i32, %c0_i32_0, %c0_i32_1 : i32, i32, i32, i32
  }
}

module attributes {stable_mosaic.version = 11 : i64} {
  func.func @_linear_kernel(%arg0: i32, %arg1: i32, %arg2: i32, %arg3: memref<16x32xf32, #tpu.memory_space<vmem>>, %arg4: memref<64x32xf32, #tpu.memory_space<vmem>>, %arg5: memref<1x64xf32, #tpu.memory_space<vmem>>, %arg6: memref<16x64xf32, #tpu.memory_space<vmem>>, %arg7: memref<16x64xf32, #tpu.memory_space<vmem>>) attributes {dimension_semantics = [#tpu.dimension_semantics<parallel>, #tpu.dimension_semantics<parallel>, #tpu.dimension_semantics<arbitrary>], iteration_bounds = array<i64: 1, 1, 1>, scalar_prefetch = 0 : i64, scratch_operands = 1 : i64, tpu.core_type = #tpu.core_type<tc>, window_params = [{transform_indices = @transform_0, window_bounds = array<i64: 16, 32>}, {transform_indices = @transform_1, window_bounds = array<i64: 64, 32>}, {transform_indices = @transform_2, window_bounds = array<i64: 1, 64>}, {transform_indices = @transform_3, window_bounds = array<i64: 16, 64>}]} {
    %c0_i32 = arith.constant 0 : i32
    %0 = arith.cmpi eq, %arg2, %c0_i32 : i32
    %1 = arith.extui %0 : i1 to i32
    %c0_i32_0 = arith.constant 0 : i32
    %2 = arith.cmpi ne, %1, %c0_i32_0 : i32
    scf.if %2 {
      %cst_10 = arith.constant 0.000000e+00 : f32
      %12 = vector.broadcast %cst_10 : f32 to vector<16x64xf32>
      %c0_11 = arith.constant 0 : index
      %c0_12 = arith.constant 0 : index
      %13 = vector.load %arg7[%c0_11, %c0_12] : memref<16x64xf32, #tpu.memory_space<vmem>>, vector<16x64xf32>
      tpu.vector_store %arg7[%c0_11, %c0_12], %12 {strides = array<i32>} : memref<16x64xf32, #tpu.memory_space<vmem>>, vector<16x64xf32>,
    } else {
    }
    %c0 = arith.constant 0 : index
    %c0_1 = arith.constant 0 : index
    %3 = vector.load %arg7[%c0, %c0_1] : memref<16x64xf32, #tpu.memory_space<vmem>>, vector<16x64xf32>
    %c0_2 = arith.constant 0 : index
    %c0_3 = arith.constant 0 : index
    %4 = vector.load %arg3[%c0_2, %c0_3] : memref<16x32xf32, #tpu.memory_space<vmem>>, vector<16x32xf32>
    %c0_4 = arith.constant 0 : index
    %c0_5 = arith.constant 0 : index
    %5 = vector.load %arg4[%c0_4, %c0_5] : memref<64x32xf32, #tpu.memory_space<vmem>>, vector<64x32xf32>
    %cst = arith.constant dense<0.000000e+00> : vector<16x64xf32>
    %6 = tpu.matmul %4, %5, %cst {dimension_numbers = #tpu.dot_dimension_numbers<[1], [1], [0], [0], [0, 0, 1, 0], [], []>} : vector<16x32xf32>, vector<64x32xf32>, vector<16x64xf32> -> vector<16x64xf32>
    %7 = arith.addf %3, %6 : vector<16x64xf32>
    %c0_6 = arith.constant 0 : index
    %c0_7 = arith.constant 0 : index
    %8 = vector.load %arg7[%c0_6, %c0_7] : memref<16x64xf32, #tpu.memory_space<vmem>>, vector<16x64xf32>
    tpu.vector_store %arg7[%c0_6, %c0_7], %7 {strides = array<i32>} : memref<16x64xf32, #tpu.memory_space<vmem>>, vector<16x64xf32>,
    %c0_i32_8 = arith.constant 0 : i32
    %9 = arith.cmpi eq, %arg2, %c0_i32_8 : i32
    %10 = arith.extui %9 : i1 to i32
    %c0_i32_9 = arith.constant 0 : i32
    %11 = arith.cmpi ne, %10, %c0_i32_9 : i32
    scf.if %11 {
      %c0_10 = arith.constant 0 : index
      %c0_11 = arith.constant 0 : index
      %12 = vector.load %arg7[%c0_10, %c0_11] : memref<16x64xf32, #tpu.memory_space<vmem>>, vector<16x64xf32>
      %c0_12 = arith.constant 0 : index
      %c0_13 = arith.constant 0 : index
      %13 = vector.load %arg5[%c0_12, %c0_13] : memref<1x64xf32, #tpu.memory_space<vmem>>, vector<1x64xf32>
      %14 = vector.broadcast %13 : vector<1x64xf32> to vector<16x64xf32>
      %15 = arith.addf %12, %14 : vector<16x64xf32>
      %c0_14 = arith.constant 0 : index
      %c0_15 = arith.constant 0 : index
      %16 = vector.load %arg6[%c0_14, %c0_15] : memref<16x64xf32, #tpu.memory_space<vmem>>, vector<16x64xf32>
      tpu.vector_store %arg6[%c0_14, %c0_15], %15 {strides = array<i32>} : memref<16x64xf32, #tpu.memory_space<vmem>>, vector<16x64xf32>,
    } else {
    }
    return
  }
  func.func @transform_0(%arg0: i32, %arg1: i32, %arg2: i32) -> (i32, i32) {
    %c0_i32 = arith.constant 0 : i32
    return %arg0, %arg2 : i32, i32
  }
  func.func @transform_1(%arg0: i32, %arg1: i32, %arg2: i32) -> (i32, i32) {
    %c0_i32 = arith.constant 0 : i32
    return %arg1, %arg2 : i32, i32
  }
  func.func @transform_2(%arg0: i32, %arg1: i32, %arg2: i32) -> (i32, i32) {
    %c0_i32 = arith.constant 0 : i32
    %c0_i32_0 = arith.constant 0 : i32
    return %c0_i32, %arg1 : i32, i32
  }
  func.func @transform_3(%arg0: i32, %arg1: i32, %arg2: i32) -> (i32, i32) {
    %c0_i32 = arith.constant 0 : i32
    return %arg0, %arg1 : i32, i32
  }
}

module attributes {stable_mosaic.version = 11 : i64} {
  func.func @_linear_kernel(%arg0: i32, %arg1: i32, %arg2: i32, %arg3: memref<16x32xf32, #tpu.memory_space<vmem>>, %arg4: memref<64x32xf32, #tpu.memory_space<vmem>>, %arg5: memref<1x64xf32, #tpu.memory_space<vmem>>, %arg6: memref<16x64xf32, #tpu.memory_space<vmem>>, %arg7: memref<16x64xf32, #tpu.memory_space<vmem>>) attributes {dimension_semantics = [#tpu.dimension_semantics<parallel>, #tpu.dimension_semantics<parallel>, #tpu.dimension_semantics<arbitrary>], iteration_bounds = array<i64: 1, 1, 1>, scalar_prefetch = 0 : i64, scratch_operands = 1 : i64, tpu.core_type = #tpu.core_type<tc>, window_params = [{transform_indices = @transform_0, window_bounds = array<i64: 16, 32>}, {transform_indices = @transform_1, window_bounds = array<i64: 64, 32>}, {transform_indices = @transform_2, window_bounds = array<i64: 1, 64>}, {transform_indices = @transform_3, window_bounds = array<i64: 16, 64>}]} {
    %c0_i32 = arith.constant 0 : i32
    %0 = arith.cmpi eq, %arg2, %c0_i32 : i32
    %1 = arith.extui %0 : i1 to i32
    %c0_i32_0 = arith.constant 0 : i32
    %2 = arith.cmpi ne, %1, %c0_i32_0 : i32
    scf.if %2 {
      %cst_10 = arith.constant 0.000000e+00 : f32
      %12 = vector.broadcast %cst_10 : f32 to vector<16x64xf32>
      %c0_11 = arith.constant 0 : index
      %c0_12 = arith.constant 0 : index
      %13 = vector.load %arg7[%c0_11, %c0_12] : memref<16x64xf32, #tpu.memory_space<vmem>>, vector<16x64xf32>
      tpu.vector_store %arg7[%c0_11, %c0_12], %12 {strides = array<i32>} : memref<16x64xf32, #tpu.memory_space<vmem>>, vector<16x64xf32>,
    } else {
    }
    %c0 = arith.constant 0 : index
    %c0_1 = arith.constant 0 : index
    %3 = vector.load %arg7[%c0, %c0_1] : memref<16x64xf32, #tpu.memory_space<vmem>>, vector<16x64xf32>
    %c0_2 = arith.constant 0 : index
    %c0_3 = arith.constant 0 : index
    %4 = vector.load %arg3[%c0_2, %c0_3] : memref<16x32xf32, #tpu.memory_space<vmem>>, vector<16x32xf32>
    %c0_4 = arith.constant 0 : index
    %c0_5 = arith.constant 0 : index
    %5 = vector.load %arg4[%c0_4, %c0_5] : memref<64x32xf32, #tpu.memory_space<vmem>>, vector<64x32xf32>
    %cst = arith.constant dense<0.000000e+00> : vector<16x64xf32>
    %6 = tpu.matmul %4, %5, %cst {dimension_numbers = #tpu.dot_dimension_numbers<[1], [1], [0], [0], [0, 0, 1, 0], [], []>} : vector<16x32xf32>, vector<64x32xf32>, vector<16x64xf32> -> vector<16x64xf32>
    %7 = arith.addf %3, %6 : vector<16x64xf32>
    %c0_6 = arith.constant 0 : index
    %c0_7 = arith.constant 0 : index
    %8 = vector.load %arg7[%c0_6, %c0_7] : memref<16x64xf32, #tpu.memory_space<vmem>>, vector<16x64xf32>
    tpu.vector_store %arg7[%c0_6, %c0_7], %7 {strides = array<i32>} : memref<16x64xf32, #tpu.memory_space<vmem>>, vector<16x64xf32>,
    %c0_i32_8 = arith.constant 0 : i32
    %9 = arith.cmpi eq, %arg2, %c0_i32_8 : i32
    %10 = arith.extui %9 : i1 to i32
    %c0_i32_9 = arith.constant 0 : i32
    %11 = arith.cmpi ne, %10, %c0_i32_9 : i32
    scf.if %11 {
      %c0_10 = arith.constant 0 : index
      %c0_11 = arith.constant 0 : index
      %12 = vector.load %arg7[%c0_10, %c0_11] : memref<16x64xf32, #tpu.memory_space<vmem>>, vector<16x64xf32>
      %c0_12 = arith.constant 0 : index
      %c0_13 = arith.constant 0 : index
      %13 = vector.load %arg5[%c0_12, %c0_13] : memref<1x64xf32, #tpu.memory_space<vmem>>, vector<1x64xf32>
      %14 = vector.broadcast %13 : vector<1x64xf32> to vector<16x64xf32>
      %15 = arith.addf %12, %14 : vector<16x64xf32>
      %cst_14 = arith.constant 0.000000e+00 : f32
      %16 = vector.broadcast %cst_14 : f32 to vector<16x64xf32>
      %17 = arith.maximumf %15, %16 : vector<16x64xf32>
      %c0_15 = arith.constant 0 : index
      %c0_16 = arith.constant 0 : index
      %18 = vector.load %arg6[%c0_15, %c0_16] : memref<16x64xf32, #tpu.memory_space<vmem>>, vector<16x64xf32>
      tpu.vector_store %arg6[%c0_15, %c0_16], %17 {strides = array<i32>} : memref<16x64xf32, #tpu.memory_space<vmem>>, vector<16x64xf32>,
    } else {
    }
    return
  }
  func.func @transform_0(%arg0: i32, %arg1: i32, %arg2: i32) -> (i32, i32) {
    %c0_i32 = arith.constant 0 : i32
    return %arg0, %arg2 : i32, i32
  }
  func.func @transform_1(%arg0: i32, %arg1: i32, %arg2: i32) -> (i32, i32) {
    %c0_i32 = arith.constant 0 : i32
    return %arg1, %arg2 : i32, i32
  }
  func.func @transform_2(%arg0: i32, %arg1: i32, %arg2: i32) -> (i32, i32) {
    %c0_i32 = arith.constant 0 : i32
    %c0_i32_0 = arith.constant 0 : i32
    return %c0_i32, %arg1 : i32, i32
  }
  func.func @transform_3(%arg0: i32, %arg1: i32, %arg2: i32) -> (i32, i32) {
    %c0_i32 = arith.constant 0 : i32
    return %arg0, %arg1 : i32, i32
  }
}

module attributes {stable_mosaic.version = 11 : i64} {
  func.func @_linear_kernel(%arg0: i32, %arg1: i32, %arg2: i32, %arg3: memref<16x64xf32, #tpu.memory_space<vmem>>, %arg4: memref<32x64xf32, #tpu.memory_space<vmem>>, %arg5: memref<1x32xf32, #tpu.memory_space<vmem>>, %arg6: memref<16x32xf32, #tpu.memory_space<vmem>>, %arg7: memref<16x32xf32, #tpu.memory_space<vmem>>) attributes {dimension_semantics = [#tpu.dimension_semantics<parallel>, #tpu.dimension_semantics<parallel>, #tpu.dimension_semantics<arbitrary>], iteration_bounds = array<i64: 1, 1, 1>, scalar_prefetch = 0 : i64, scratch_operands = 1 : i64, tpu.core_type = #tpu.core_type<tc>, window_params = [{transform_indices = @transform_0, window_bounds = array<i64: 16, 64>}, {transform_indices = @transform_1, window_bounds = array<i64: 32, 64>}, {transform_indices = @transform_2, window_bounds = array<i64: 1, 32>}, {transform_indices = @transform_3, window_bounds = array<i64: 16, 32>}]} {
    %c0_i32 = arith.constant 0 : i32
    %0 = arith.cmpi eq, %arg2, %c0_i32 : i32
    %1 = arith.extui %0 : i1 to i32
    %c0_i32_0 = arith.constant 0 : i32
    %2 = arith.cmpi ne, %1, %c0_i32_0 : i32
    scf.if %2 {
      %cst_10 = arith.constant 0.000000e+00 : f32
      %12 = vector.broadcast %cst_10 : f32 to vector<16x32xf32>
      %c0_11 = arith.constant 0 : index
      %c0_12 = arith.constant 0 : index
      %13 = vector.load %arg7[%c0_11, %c0_12] : memref<16x32xf32, #tpu.memory_space<vmem>>, vector<16x32xf32>
      tpu.vector_store %arg7[%c0_11, %c0_12], %12 {strides = array<i32>} : memref<16x32xf32, #tpu.memory_space<vmem>>, vector<16x32xf32>,
    } else {
    }
    %c0 = arith.constant 0 : index
    %c0_1 = arith.constant 0 : index
    %3 = vector.load %arg7[%c0, %c0_1] : memref<16x32xf32, #tpu.memory_space<vmem>>, vector<16x32xf32>
    %c0_2 = arith.constant 0 : index
    %c0_3 = arith.constant 0 : index
    %4 = vector.load %arg3[%c0_2, %c0_3] : memref<16x64xf32, #tpu.memory_space<vmem>>, vector<16x64xf32>
    %c0_4 = arith.constant 0 : index
    %c0_5 = arith.constant 0 : index
    %5 = vector.load %arg4[%c0_4, %c0_5] : memref<32x64xf32, #tpu.memory_space<vmem>>, vector<32x64xf32>
    %cst = arith.constant dense<0.000000e+00> : vector<16x32xf32>
    %6 = tpu.matmul %4, %5, %cst {dimension_numbers = #tpu.dot_dimension_numbers<[1], [1], [0], [0], [0, 0, 1, 0], [], []>} : vector<16x64xf32>, vector<32x64xf32>, vector<16x32xf32> -> vector<16x32xf32>
    %7 = arith.addf %3, %6 : vector<16x32xf32>
    %c0_6 = arith.constant 0 : index
    %c0_7 = arith.constant 0 : index
    %8 = vector.load %arg7[%c0_6, %c0_7] : memref<16x32xf32, #tpu.memory_space<vmem>>, vector<16x32xf32>
    tpu.vector_store %arg7[%c0_6, %c0_7], %7 {strides = array<i32>} : memref<16x32xf32, #tpu.memory_space<vmem>>, vector<16x32xf32>,
    %c0_i32_8 = arith.constant 0 : i32
    %9 = arith.cmpi eq, %arg2, %c0_i32_8 : i32
    %10 = arith.extui %9 : i1 to i32
    %c0_i32_9 = arith.constant 0 : i32
    %11 = arith.cmpi ne, %10, %c0_i32_9 : i32
    scf.if %11 {
      %c0_10 = arith.constant 0 : index
      %c0_11 = arith.constant 0 : index
      %12 = vector.load %arg7[%c0_10, %c0_11] : memref<16x32xf32, #tpu.memory_space<vmem>>, vector<16x32xf32>
      %c0_12 = arith.constant 0 : index
      %c0_13 = arith.constant 0 : index
      %13 = vector.load %arg5[%c0_12, %c0_13] : memref<1x32xf32, #tpu.memory_space<vmem>>, vector<1x32xf32>
      %14 = vector.broadcast %13 : vector<1x32xf32> to vector<16x32xf32>
      %15 = arith.addf %12, %14 : vector<16x32xf32>
      %c0_14 = arith.constant 0 : index
      %c0_15 = arith.constant 0 : index
      %16 = vector.load %arg6[%c0_14, %c0_15] : memref<16x32xf32, #tpu.memory_space<vmem>>, vector<16x32xf32>
      tpu.vector_store %arg6[%c0_14, %c0_15], %15 {strides = array<i32>} : memref<16x32xf32, #tpu.memory_space<vmem>>, vector<16x32xf32>,
    } else {
    }
    return
  }
  func.func @transform_0(%arg0: i32, %arg1: i32, %arg2: i32) -> (i32, i32) {
    %c0_i32 = arith.constant 0 : i32
    return %arg0, %arg2 : i32, i32
  }
  func.func @transform_1(%arg0: i32, %arg1: i32, %arg2: i32) -> (i32, i32) {
    %c0_i32 = arith.constant 0 : i32
    return %arg1, %arg2 : i32, i32
  }
  func.func @transform_2(%arg0: i32, %arg1: i32, %arg2: i32) -> (i32, i32) {
    %c0_i32 = arith.constant 0 : i32
    %c0_i32_0 = arith.constant 0 : i32
    return %c0_i32, %arg1 : i32, i32
  }
  func.func @transform_3(%arg0: i32, %arg1: i32, %arg2: i32) -> (i32, i32) {
    %c0_i32 = arith.constant 0 : i32
    return %arg0, %arg1 : i32, i32
  }
}

</mosaic_0001>

<bundles_post_ra>
// kernel: decoder_layer.12
= control target key start
LH: loop header
LB: loop body
LE: loop exit
PB: predicated region body
PF: predicated region fallthrough
CT: control target
= control target key end

     0   :  { %vm37_vm0 = vcmask 261120   ;;  %vm18_vm1 = vcmask 785408   ;;  %v237_v2 = vmov 0.0   ;;  %s341_s1 = inlined_call_operand.vmem [shape: f32[96,32], index: 1, kind: input, shape index: {}]   ;;  %s342_s0 = inlined_call_operand.vmem [shape: f32[16,32], index: 0, kind: input, shape index: {}]   ;;  %s343_s2 = inlined_call_operand.vmem [shape: f32[1,96], index: 2, kind: input, shape index: {}]   ;;  %s344_s3 = inlined_call_operand.vmem [shape: f32[16,96], index: 3, kind: output, shape index: {}]  }
   0x1   :  { %v36_v0 = vld [vmem:[%s341_s1 + $0x58] sm:$0xff]  ;;  %v35_v1 = vld [vmem:[%s341_s1 + $0x50] sm:$0xff]  ;;  %20 = vst.msk [vmem:[#allocation2 + $0x8] sm:$0xff] %vm18_vm1, %v237_v2  ;;  %19 = vst.msk [vmem:[#allocation2] sm:$0xff] %vm18_vm1, %v237_v2 }
   0x2   :  { %209 = vmatprep.subr.msk.mxu0 %vm37_vm0, %v36_v0  ;;  %v34_v3 = vld [vmem:[%s341_s1 + $0x48] sm:$0xff]  ;;  %v23_v4 = vld [vmem:[%s342_s0] sm:$0xff]  ;;  %v32_v6 = vld [vmem:[%s341_s1 + $0x38] sm:$0xff] }
   0x3   :  { %210 = vmatpush3.xpose.msk.msra.mxu0 %vm37_vm0, %v36_v0  ;;  %233 = vmatprep.mubr.msk.f32.mxu0 %vm37_vm0, %v23_v4  ;;  %v33_v5 = vld [vmem:[%s341_s1 + $0x40] sm:$0xff]  ;;  %v31_v7 = vld [vmem:[%s341_s1 + $0x30] sm:$0xff]  ;;  %v30_v8 = vld [vmem:[%s341_s1 + $0x28] sm:$0xff] }
   0x4   :  { %211 = vmatprep.subr.msk.mxu0 %vm37_vm0, %v35_v1  ;;  %v29_v9 = vld [vmem:[%s341_s1 + $0x20] sm:$0xff]  ;;  %v28_v10 = vld [vmem:[%s341_s1 + $0x18] sm:$0xff]  ;;  %v27_v11 = vld [vmem:[%s341_s1 + $0x10] sm:$0xff] }
   0x5   :  { %v26_v12 = vld [vmem:[%s341_s1 + $0x8] sm:$0xff]  ;;  %v25_v13 = vld [vmem:[%s341_s1] sm:$0xff] }
   0x6   :  { %v24_v14 = vld [vmem:[%s342_s0 + $0x8] sm:$0xff]  ;;  %v194_v21 = vld [vmem:[%s343_s2] ss:$0 sm:$0xff] }
   0x7   :  { %212 = vmatpush3.xpose.msk.msra.mxu0 %vm37_vm0, %v35_v1 }
   0x8   :  { %213 = vmatprep.subr.msk.mxu0 %vm37_vm0, %v34_v3  ;;  %v22_v15 = vld [vmem:[#allocation2 + $0x8] sm:$0xff]  ;;  %v21_v17 = vld [vmem:[#allocation2] sm:$0xff] }
   0xb   :  { %214 = vmatpush3.xpose.msk.msra.mxu0 %vm37_vm0, %v34_v3 }
   0xc   :  { %215 = vmatprep.subr.msk.mxu0 %vm37_vm0, %v33_v5 }
   0xf   :  { %216 = vmatpush3.xpose.msk.msra.mxu0 %vm37_vm0, %v33_v5 }
  0x10   :  { %217 = vmatprep.subr.msk.mxu0 %vm37_vm0, %v32_v6 }
  0x13   :  { %218 = vmatpush3.xpose.msk.msra.mxu0 %vm37_vm0, %v32_v6 }
  0x14   :  { %219 = vmatprep.subr.msk.mxu0 %vm37_vm0, %v31_v7 }
  0x17   :  { %220 = vmatpush3.xpose.msk.msra.mxu0 %vm37_vm0, %v31_v7 }
  0x18   :  { %221 = vmatprep.subr.msk.mxu0 %vm37_vm0, %v30_v8 }
  0x1b   :  { %222 = vmatpush3.xpose.msk.msra.mxu0 %vm37_vm0, %v30_v8 }
  0x1c   :  { %223 = vmatprep.subr.msk.mxu0 %vm37_vm0, %v29_v9 }
  0x1f   :  { %224 = vmatpush3.xpose.msk.msra.mxu0 %vm37_vm0, %v29_v9 }
  0x20   :  { %225 = vmatprep.subr.msk.mxu0 %vm37_vm0, %v28_v10 }
  0x23   :  { %226 = vmatpush3.xpose.msk.msra.mxu0 %vm37_vm0, %v28_v10 }
  0x24   :  { %227 = vmatprep.subr.msk.mxu0 %vm37_vm0, %v27_v11 }
  0x27   :  { %228 = vmatpush3.xpose.msk.msra.mxu0 %vm37_vm0, %v27_v11 }
  0x28   :  { %229 = vmatprep.subr.msk.mxu0 %vm37_vm0, %v26_v12 }
  0x2b   :  { %230 = vmatpush3.xpose.msk.msra.mxu0 %vm37_vm0, %v26_v12 }
  0x2c   :  { %231 = vmatprep.subr.msk.mxu0 %vm37_vm0, %v25_v13 }
  0x2f   :  { %232 = vmatpush3.xpose.msk.msra.mxu0 %vm37_vm0, %v25_v13 }
  0x32   :  { %234 = vmatmul.mubr.msk.f32.vlgmr.msra.gmra.mxu0 %vm37_vm0, %v24_v14 }
  0xf2   :  { %v235_v16 = vpop.f32.mrf.mxu0 }
  0xf3   :  { %v156_v18 = vadd.f32 %v235_v16, %v22_v15 }
  0xf4   :  { %v146_v19 = vpop.f32.mrf.mxu0 }
  0xf5   :  { %159 = vst.msk [vmem:[#allocation2 + $0x8] sm:$0xff] %vm18_vm1, %v156_v18  ;;  %v155_v20 = vadd.f32 %v146_v19, %v21_v17 }
  0xf7   :  { %158 = vst.msk [vmem:[#allocation2] sm:$0xff] %vm18_vm1, %v155_v20 }
  0xfc   :  { %v164_v22 = vld [vmem:[#allocation2 + $0x8] sm:$0xff] }
  0xfd   :  { %v173_v23 = vadd.f32 %v194_v21, %v164_v22 }
  0xfe   :  { %v163_v24 = vld [vmem:[#allocation2] sm:$0xff] }
  0xff   :  { %175 = vst.msk [vmem:[%s344_s3 + $0x8] sm:$0xff] %vm18_vm1, %v173_v23  ;;  %v172_v25 = vadd.f32 %v194_v21, %v163_v24 }
 0x101   :  { %174 = vst.msk [vmem:[%s344_s3] sm:$0xff] %vm18_vm1, %v172_v25 }

// kernel: decoder_layer.15
= control target key start
LH: loop header
LB: loop body
LE: loop exit
PB: predicated region body
PF: predicated region fallthrough
CT: control target
= control target key end

     0   :  { %vm23_vm0 = vcmask 261120   ;;  %s136_s0 = inlined_call_operand.vmem [shape: f32[16,32], index: 0, kind: input, shape index: {}]   ;;  %s137_s1 = inlined_call_operand.vmem [shape: f32[16,32], index: 1, kind: input, shape index: {}]   ;;  %s138_s2 = inlined_call_operand.vmem [shape: f32[1,32], index: 2, kind: input, shape index: {}]   ;;  %s139_s3 = inlined_call_operand.vmem [shape: f32[1,32], index: 3, kind: input, shape index: {}]   ;;  %s140_s4 = inlined_call_operand.vmem [shape: f32[16,32], index: 4, kind: output, shape index: {}]  }
   0x1   :  { %v17_v0 = vld [vmem:[%s136_s0] sm:$0xff]  ;;  %v18_v2 = vld [vmem:[%s136_s0 + $0x8] sm:$0xff] }
   0x2   :  { %v19_v1 = vld [vmem:[%s137_s1] sm:$0xff]  ;;  %v20_v4 = vld [vmem:[%s137_s1 + $0x8] sm:$0xff] }
   0x3   :  { %v21_v3 = vadd.f32 %v19_v1, %v17_v0  ;;  %v22_v5 = vadd.f32 %v20_v4, %v18_v2  ;;  %v75_v25 = vld [vmem:[%s138_s2] ss:$0 sm:$0xff] }
   0x4   :  { %v76_v27 = vld [vmem:[%s139_s3] ss:$0 sm:$0xff] }
   0x5   :  { %v24_v6 = vsel %vm23_vm0, %v21_v3, 0.0  ;;  %v27_v7 = vsel %vm23_vm0, %v22_v5, 0.0 }
   0x6   :  { %25 = vadd.xlane.f32.xlu0 %v24_v6 }
   0xa   :  { %28 = vadd.xlane.f32.xlu0 %v27_v7 }
  0x8f   :  { %v26_v8 = vpop.xlane.xlu0 %25 }
  0x90   :  { %v31_v9 = vmul.f32 0.03125, %v26_v8 }
  0x92   :  { %v33_v10 = vsub.f32 %v21_v3, %v31_v9 }
  0x93   :  { %v29_v11 = vpop.xlane.xlu0 %28 }
  0x94   :  { %v32_v12 = vmul.f32 0.03125, %v29_v11  ;;  %v35_v13 = vmul.f32 %v33_v10, %v33_v10 }
  0x96   :  { %v34_v14 = vsub.f32 %v22_v5, %v32_v12  ;;  %v37_v15 = vsel %vm23_vm0, %v35_v13, 0.0 }
  0x97   :  { %38 = vadd.xlane.f32.xlu1 %v37_v15 }
  0x98   :  { %v36_v16 = vmul.f32 %v34_v14, %v34_v14 }
  0x9a   :  { %v40_v17 = vsel %vm23_vm0, %v36_v16, 0.0 }
  0x9b   :  { %41 = vadd.xlane.f32.xlu1 %v40_v17 }
 0x120   :  { %v39_v18 = vpop.xlane.xlu1 %38 }
 0x121   :  { %v43_v19 = vmul.f32 0.03125, %v39_v18 }
 0x123   :  { %v45_v20 = vadd.f32 1e-05, %v43_v19 }
 0x124   :  { %v42_v21 = vpop.xlane.xlu1 %41 }
 0x125   :  { %77 = vrsqrt.f32 %v45_v20  ;;  %v44_v22 = vmul.f32 0.03125, %v42_v21 }
 0x127   :  { %v46_v23 = vadd.f32 1e-05, %v44_v22 }
 0x129   :  { %79 = vrsqrt.f32 %v46_v23 }
 0x132   :  { %v78_v24 = vpop.eup %77 }
 0x133   :  { %v49_v26 = vmul.f32 %v78_v24, %v33_v10 }
 0x135   :  { %v58_v28 = vmul.f32 %v75_v25, %v49_v26 }
 0x136   :  { %v80_v29 = vpop.eup %79 }
 0x137   :  { %v67_v30 = vadd.f32 %v76_v27, %v58_v28  ;;  %v50_v31 = vmul.f32 %v80_v29, %v34_v14 }
 0x139   :  { %69 = vst.msk [vmem:[%s140_s4] sm:$0xff] %vm23_vm0, %v67_v30  ;;  %v59_v32 = vmul.f32 %v75_v25, %v50_v31 }
 0x13b   :  { %v68_v33 = vadd.f32 %v76_v27, %v59_v32 }
 0x13d   :  { %70 = vst.msk [vmem:[%s140_s4 + $0x8] sm:$0xff] %vm23_vm0, %v68_v33 }

// kernel: decoder_layer.14
= control target key start
LH: loop header
LB: loop body
LE: loop exit
PB: predicated region body
PF: predicated region fallthrough
CT: control target
= control target key end

     0   :  { %vm18_vm0 = vcmask 261120   ;;  %v172_v2 = vmov 0.0   ;;  %s236_s1 = inlined_call_operand.vmem [shape: f32[32,32], index: 1, kind: input, shape index: {}]   ;;  %s237_s0 = inlined_call_operand.vmem [shape: f32[16,32], index: 0, kind: input, shape index: {}]   ;;  %s238_s2 = inlined_call_operand.vmem [shape: f32[1,32], index: 2, kind: input, shape index: {}]   ;;  %s239_s3 = inlined_call_operand.vmem [shape: f32[16,32], index: 3, kind: output, shape index: {}]  }
   0x1   :  { %v28_v0 = vld [vmem:[%s236_s1 + $0x18] sm:$0xff]  ;;  %v27_v1 = vld [vmem:[%s236_s1 + $0x10] sm:$0xff]  ;;  %20 = vst.msk [vmem:[#allocation2 + $0x8] sm:$0xff] %vm18_vm0, %v172_v2  ;;  %19 = vst.msk [vmem:[#allocation2] sm:$0xff] %vm18_vm0, %v172_v2 }
   0x2   :  { %160 = vmatprep.subr.msk.mxu0 %vm18_vm0, %v28_v0  ;;  %v23_v3 = vld [vmem:[%s237_s0] sm:$0xff]  ;;  %v26_v4 = vld [vmem:[%s236_s1 + $0x8] sm:$0xff] }
   0x3   :  { %161 = vmatpush3.xpose.msk.msra.mxu0 %vm18_vm0, %v28_v0  ;;  %168 = vmatprep.mubr.msk.f32.mxu0 %vm18_vm0, %v23_v3  ;;  %v25_v5 = vld [vmem:[%s236_s1] sm:$0xff]  ;;  %v24_v6 = vld [vmem:[%s237_s0 + $0x8] sm:$0xff] }
   0x4   :  { %162 = vmatprep.subr.msk.mxu0 %vm18_vm0, %v27_v1  ;;  %v153_v13 = vld [vmem:[%s238_s2] ss:$0 sm:$0xff] }
   0x7   :  { %163 = vmatpush3.xpose.msk.msra.mxu0 %vm18_vm0, %v27_v1 }
   0x8   :  { %164 = vmatprep.subr.msk.mxu0 %vm18_vm0, %v26_v4  ;;  %v22_v7 = vld [vmem:[#allocation2 + $0x8] sm:$0xff]  ;;  %v21_v9 = vld [vmem:[#allocation2] sm:$0xff] }
   0xb   :  { %165 = vmatpush3.xpose.msk.msra.mxu0 %vm18_vm0, %v26_v4 }
   0xc   :  { %166 = vmatprep.subr.msk.mxu0 %vm18_vm0, %v25_v5 }
   0xf   :  { %167 = vmatpush3.xpose.msk.msra.mxu0 %vm18_vm0, %v25_v5 }
  0x12   :  { %169 = vmatmul.mubr.msk.f32.vlgmr.msra.gmra.mxu0 %vm18_vm0, %v24_v6 }
  0xd2   :  { %v170_v8 = vpop.f32.mrf.mxu0 }
  0xd3   :  { %v124_v10 = vadd.f32 %v170_v8, %v22_v7 }
  0xd4   :  { %v114_v11 = vpop.f32.mrf.mxu0 }
  0xd5   :  { %126 = vst.msk [vmem:[#allocation2 + $0x8] sm:$0xff] %vm18_vm0, %v124_v10  ;;  %v123_v12 = vadd.f32 %v114_v11, %v21_v9 }
  0xd7   :  { %125 = vst.msk [vmem:[#allocation2] sm:$0xff] %vm18_vm0, %v123_v12 }
  0xdc   :  { %v131_v14 = vld [vmem:[#allocation2 + $0x8] sm:$0xff] }
  0xdd   :  { %v140_v15 = vadd.f32 %v153_v13, %v131_v14 }
  0xde   :  { %v130_v16 = vld [vmem:[#allocation2] sm:$0xff] }
  0xdf   :  { %142 = vst.msk [vmem:[%s239_s3 + $0x8] sm:$0xff] %vm18_vm0, %v140_v15  ;;  %v139_v17 = vadd.f32 %v153_v13, %v130_v16 }
  0xe1   :  { %141 = vst.msk [vmem:[%s239_s3] sm:$0xff] %vm18_vm0, %v139_v17 }

// kernel: decoder_layer.13
= control target key start
LH: loop header
LB: loop body
LE: loop exit
PB: predicated region body
PF: predicated region fallthrough
CT: control target
= control target key end

     0   :  { %s1208_s18 = smov 0   ;;  %s1312_s0 = inlined_call_operand.vmem [shape: f32[2,8,32], index: 0, kind: input, shape index: {}]   ;;  %s1313_s1 = inlined_call_operand.vmem [shape: f32[2,8,32], index: 1, kind: input, shape index: {}]   ;;  %s1314_s2 = inlined_call_operand.vmem [shape: f32[2,8,32], index: 2, kind: input, shape index: {}]   ;;  %s1315_s3 = inlined_call_operand.vmem [shape: f32[8,8], index: 3, kind: input, shape index: {}]   ;;  %s1316_s4 = inlined_call_operand.vmem [shape: f32[2,1,8], index: 4, kind: input, shape index: {}]   ;;  %s1317_s5 = inlined_call_operand.vmem [shape: f32[2,8,32], index: 5, kind: output, shape index: {}]  }
   0x1 LB: > { %s1050_s19 = sadd.s32 4294967295, %s1168_s18   ;;  %p1054_p0 = scmp.ge.s32.totalorder %s1168_s18, 1  ;;  %s1168_s18 = sphi %s1208_s18, %s15_s18  }
   0x2   : > { %p212_p1 = scmp.lt.s32.totalorder %s1168_s18, 3 }
   0x4   : > { %p213_p2 = pnand %p1054_p0, %p212_p1 }
   0x5   : > { %p249_p3 = scmp.lt.s32.totalorder (!%p213_p2), %s1050_s19, 1  ;;  %s1172_s7 = smov (!%p213_p2), 120  }
   0x6   : > { %216 = sbr.rel (%p213_p2) target bundleno = 1403 (0x57b), region = 40  ;;  %s1173_s8 = smov (!%p213_p2), 112  }
   0x7   : > { %s1174_s9 = smov (!%p213_p2), 104   ;;  %s1175_s13 = smov (!%p213_p2), 8  }
   0x8   : > { %s1176_s14 = smov (!%p213_p2), 16   ;;  %s1177_s15 = smov (!%p213_p2), 24  }
   0xb   : > { %v1170_v0 = vmov 0.0   ;;  %vm1171_vm0 = vmmov 0   ;;  %s1319_s19 = smov (!%p249_p3, %s1050_s19), 1  ;;  %vm280_vm1 = vcmask 64512   ;;  %v271_v3 = vld [vmem:[%s1315_s3] sm:$0xff]  ;;  %vm958_vm2 = vcmask 130048  }
   0xc   : > { %1090 = vmatprep.subr.mxu0 %v1170_v0  ;;  %1092 = vmatprep.mubr.msk.f32.mxu0 %vm1171_vm0, %v1170_v0  ;;  %s1222_s20 = sshll.u32 %s1319_s19, 3  ;;  %s263_s29 = scalar_lea.vmem %s1316_s4, %s1319_s19  ;;  %vm960_vm3 = vcmask 195584   ;;  %vm962_vm4 = vcmask 261120  }
   0xd   : > { %1095 = vmatprep.subr.mxu1 %v1170_v0  ;;  %1097 = vmatprep.mubr.msk.f32.mxu1 %vm1171_vm0, %v1170_v0  ;;  %s256_s23 = scalar_lea.vmem %s1313_s1, %s1222_s20  ;;  %s252_s26 = scalar_lea.vmem %s1312_s0, %s1222_s20  ;;  %v1059_v4 = vld [vmem:[%s263_s29] ss:$0 sm:$0xff] }
   0xe   : > { %v269_v1 = vld [vmem:[%s256_s23] sm:$0xff]  ;;  %v1243_v5 = vadd.f32 %v1059_v4, %v271_v3  ;;  %s260_s12 = scalar_lea.vmem %s1314_s2, %s1222_s20  ;;  %s267_s19 = scalar_lea.vmem %s1317_s5, %s1222_s20 }
   0xf   : > { %1091 = vmatpush3.xpose.msk.msra.mxu0 %vm280_vm1, %v269_v1  ;;  %v268_v2 = vld [vmem:[%s252_s26] sm:$0xff]  ;;  %445 = vrot.lane.b32.xlu1 %v269_v1, %s1172_s7 }
  0x10   : > { %1105 = vmatprep.subr.mxu0 %v1170_v0  ;;  %v1257_v16 = vld [vmem:[%s260_s12] sm:$0xff] }
  0x11   : > { %1096 = vmatpush3.msra.mxu1 %v1257_v16 }
  0x12   : > { %1093 = vmatmul.mubr.msk.f32.vlgmr.msra.gmra.mxu0 %vm280_vm1, %v268_v2  ;;  %1100 = vmatprep.subr.mxu1 %v1170_v0 }
  0x13   : > { %1107 = vmatprep.mubr.msk.f32.mxu0 %vm1171_vm0, %v1170_v0  ;;  %443 = vrot.lane.b32.xlu1 %v268_v2, %s1172_s7 }
  0x17   : > { %611 = vrot.lane.b32.xlu1 %v268_v2, %s1173_s8 }
  0x1b   : > { %780 = vrot.lane.b32.xlu1 %v269_v1, %s1174_s9 }
  0x1f   : > { %778 = vrot.lane.b32.xlu1 %v268_v2, %s1174_s9 }
  0x81   : > { %v446_v18 = vpop.permute.xlu1 %445 }
  0x85   : > { %v444_v19 = vpop.permute.xlu1 %443 }
  0x89   : > { %v612_v21 = vpop.permute.xlu1 %611 }
  0x8d   : > { %v781_v24 = vpop.permute.xlu1 %780 }
  0x91   : > { %v779_v25 = vpop.permute.xlu1 %778 }
  0xd2   : > { %v353_v6 = vpop.f32.mrf.mxu0 }
  0xd3   : > { %v357_v7 = vmul.f32 0.35355338, %v353_v6 }
  0xd4   : > { %v1094_v8 = vpop.f32.mrf.mxu0 }
  0xd5   : > { %v358_v9 = vadd.f32 %v357_v7, %v1243_v5 }
  0xd7   : > { %v359_v10 = vsel %vm280_vm1, %v358_v9, -inf }
  0xd8   : > { %360 = vmax.xlane.f32.xlu0 %v359_v10 }
 0x161   : > { %v361_v11 = vpop.xlane.xlu0 %360 }
 0x162   : > { %v362_v12 = vsub.f32 %v358_v9, %v361_v11 }
 0x164   : > { %v363_v13 = vmul.f32 1.442695, %v362_v12 }
 0x166   : > { %1146 = vpow2.f32 %v363_v13 }
 0x173   : > { %v1147_v14 = vpop.eup %1146 }
 0x174   : > { %v365_v15 = vsel %vm280_vm1, %v1147_v14, 0.0 }
 0x175   : > { %366 = vadd.xlane.f32.xlu0 %v365_v15 }
 0x18b   : > { %613 = vrot.lane.b32.xlu0 %v269_v1, %s1173_s8 }
 0x1fe   : > { %v367_v17 = vpop.xlane.xlu0 %366 }
 0x1ff   : > { %1148 = vrcp.f32 %v367_v17 }
 0x202   : > { %v614_v23 = vpop.permute.xlu0 %613 }
 0x20c   : > { %v1149_v20 = vpop.eup %1148 }
 0x20d   : > { %v369_v22 = vmul.f32 %v1149_v20, %v1147_v14 }
 0x20f   : > { %1098 = vmatmul.mubr.msk.f32.vlgmr.msra.gmra.mxu1 %vm280_vm1, %v369_v22 }
 0x210   : > { %1101 = vmatpush3.xpose.msk.msra.mxu1 %vm280_vm1, %v446_v18  ;;  %1102 = vmatprep.mubr.msk.f32.mxu1 %vm1171_vm0, %v1170_v0 }
 0x211   : > { %1110 = vmatprep.subr.mxu1 %v1170_v0 }
 0x213   : > { %1103 = vmatmul.mubr.msk.f32.vlgmr.msra.gmra.mxu1 %vm280_vm1, %v444_v19 }
 0x214   : > { %1111 = vmatpush3.xpose.msk.msra.mxu1 %vm280_vm1, %v614_v23  ;;  %1112 = vmatprep.mubr.msk.f32.mxu1 %vm1171_vm0, %v1170_v0 }
 0x215   : > { %1120 = vmatprep.subr.mxu1 %v1170_v0 }
 0x217   : > { %1113 = vmatmul.mubr.msk.f32.vlgmr.msra.gmra.mxu1 %vm280_vm1, %v612_v21 }
 0x218   : > { %1121 = vmatpush3.xpose.msk.msra.mxu1 %vm280_vm1, %v781_v24  ;;  %1122 = vmatprep.mubr.msk.f32.mxu1 %vm1171_vm0, %v1170_v0 }
 0x21b   : > { %1123 = vmatmul.mubr.msk.f32.vlgmr.msra.gmra.mxu1 %vm280_vm1, %v779_v25 }
 0x2cf   : > { %v1277_v26 = vpop.f32.mrf.mxu1 }
 0x2d1   : > { %v1099_v27 = vpop.f32.mrf.mxu1 }
 0x2d3   : > { %v517_v28 = vpop.f32.mrf.mxu1 }
 0x2d4   : > { %v521_v29 = vmul.f32 0.35355338, %v517_v28 }
 0x2d5   : > { %v1104_v30 = vpop.f32.mrf.mxu1 }
 0x2d6   : > { %v522_v31 = vadd.f32 %v521_v29, %v1243_v5 }
 0x2d7   : > { %v685_v32 = vpop.f32.mrf.mxu1 }
 0x2d8   : > { %v689_v33 = vmul.f32 0.35355338, %v685_v32  ;;  %v523_v34 = vsel %vm280_vm1, %v522_v31, -inf }
 0x2d9   : > { %524 = vmax.xlane.f32.xlu1 %v523_v34  ;;  %v1114_v35 = vpop.f32.mrf.mxu1 }
 0x2da   : > { %v690_v36 = vadd.f32 %v689_v33, %v1243_v5 }
 0x2db   : > { %v852_v37 = vpop.f32.mrf.mxu1 }
 0x2dc   : > { %v856_v38 = vmul.f32 0.35355338, %v852_v37  ;;  %v691_v39 = vsel %vm280_vm1, %v690_v36, -inf }
 0x2dd   : > { %692 = vmax.xlane.f32.xlu0 %v691_v39  ;;  %v1124_v40 = vpop.f32.mrf.mxu1 }
 0x2de   : > { %v857_v41 = vadd.f32 %v856_v38, %v1243_v5 }
 0x2e0   : > { %v858_v42 = vsel %vm280_vm1, %v857_v41, -inf }
 0x2e1   : > { %859 = vmax.xlane.f32.xlu1 %v858_v42 }
 0x362   : > { %v525_v43 = vpop.xlane.xlu1 %524 }
 0x363   : > { %v526_v44 = vsub.f32 %v522_v31, %v525_v43 }
 0x365   : > { %v527_v45 = vmul.f32 1.442695, %v526_v44 }
 0x366   : > { %v693_v46 = vpop.xlane.xlu0 %692 }
 0x367   : > { %1150 = vpow2.f32 %v527_v45  ;;  %v694_v47 = vsub.f32 %v690_v36, %v693_v46 }
 0x369   : > { %v695_v48 = vmul.f32 1.442695, %v694_v47 }
 0x36a   : > { %v860_v53 = vpop.xlane.xlu1 %859 }
 0x36b   : > { %1152 = vpow2.f32 %v695_v48  ;;  %v861_v54 = vsub.f32 %v857_v41, %v860_v53 }
 0x36d   : > { %v862_v55 = vmul.f32 1.442695, %v861_v54 }
 0x36f   : > { %1154 = vpow2.f32 %v862_v55 }
 0x374   : > { %v1151_v49 = vpop.eup %1150 }
 0x375   : > { %v529_v50 = vsel %vm280_vm1, %v1151_v49, 0.0 }
 0x376   : > { %530 = vadd.xlane.f32.xlu1 %v529_v50 }
 0x378   : > { %v1153_v51 = vpop.eup %1152 }
 0x379   : > { %v697_v52 = vsel %vm280_vm1, %v1153_v51, 0.0 }
 0x37a   : > { %698 = vadd.xlane.f32.xlu0 %v697_v52 }
 0x37c   : > { %v1155_v56 = vpop.eup %1154 }
 0x37d   : > { %v864_v57 = vsel %vm280_vm1, %v1155_v56, 0.0 }
 0x387   : > { %702 = vrot.lane.b32.xlu1 %v1257_v16, %s1173_s8 }
 0x390   : > { %535 = vrot.lane.b32.xlu0 %v1257_v16, %s1172_s7 }
 0x3ab   : > { %865 = vadd.xlane.f32.xlu1 %v864_v57 }
 0x3bc   : > { %869 = vrot.lane.b32.xlu1 %v1257_v16, %s1174_s9 }
 0x3ff   : > { %v531_v58 = vpop.xlane.xlu1 %530 }
 0x400   : > { %1156 = vrcp.f32 %v531_v58 }
 0x403   : > { %v699_v59 = vpop.xlane.xlu0 %698  ;;  %v703_v63 = vpop.permute.xlu1 %702 }
 0x404   : > { %1158 = vrcp.f32 %v699_v59 }
 0x407   : > { %v536_v60 = vpop.permute.xlu0 %535 }
 0x408   : > { %1106 = vmatpush3.msra.mxu0 %v536_v60 }
 0x409   : > { %1115 = vmatprep.subr.mxu0 %v1170_v0 }
 0x40d   : > { %v1157_v61 = vpop.eup %1156 }
 0x40e   : > { %v533_v62 = vmul.f32 %v1157_v61, %v1151_v49 }
 0x410   : > { %1108 = vmatmul.mubr.msk.f32.vlgmr.msra.gmra.mxu0 %vm280_vm1, %v533_v62 }
 0x411   : > { %v1159_v1 = vpop.eup %1158  ;;  %1116 = vmatpush3.msra.mxu0 %v703_v63  ;;  %1117 = vmatprep.mubr.msk.f32.mxu0 %vm1171_vm0, %v1170_v0 }
 0x412   : > { %v701_v2 = vmul.f32 %v1159_v1, %v1153_v51  ;;  %1125 = vmatprep.subr.mxu0 %v1170_v0 }
 0x414   : > { %1118 = vmatmul.mubr.msk.f32.vlgmr.msra.gmra.mxu0 %vm280_vm1, %v701_v2 }
 0x415   : > { %1127 = vmatprep.mubr.msk.f32.mxu0 %vm1171_vm0, %v1170_v0 }
 0x434   : > { %v866_v3 = vpop.xlane.xlu1 %865 }
 0x435   : > { %1160 = vrcp.f32 %v866_v3 }
 0x438   : > { %v870_v4 = vpop.permute.xlu1 %869 }
 0x439   : > { %1126 = vmatpush3.msra.mxu0 %v870_v4 }
 0x442   : > { %v1161_v5 = vpop.eup %1160 }
 0x443   : > { %v868_v6 = vmul.f32 %v1161_v5, %v1155_v56 }
 0x445   : > { %1128 = vmatmul.mubr.msk.f32.vlgmr.msra.gmra.mxu0 %vm280_vm1, %v868_v6 }
 0x4d0   : > { %v607_v7 = vpop.f32.mrf.mxu0 }
 0x4d1   : > { %946 = vrot.lane.b32.xlu0 %v607_v7, %s1175_s13 }
 0x4d2   : > { %v1109_v8 = vpop.f32.mrf.mxu0 }
 0x4d4   : > { %v774_v9 = vpop.f32.mrf.mxu0 }
 0x4d5   : > { %950 = vrot.lane.b32.xlu1 %v774_v9, %s1176_s14 }
 0x4d6   : > { %v1119_v10 = vpop.f32.mrf.mxu0 }
 0x505   : > { %v941_v11 = vpop.f32.mrf.mxu0 }
 0x506   : > { %954 = vrot.lane.b32.xlu0 %v941_v11, %s1177_s15 }
 0x507   : > { %v1129_v0 = vpop.f32.mrf.mxu0 }
 0x543   : > { %v947_v12 = vpop.permute.xlu0 %946 }
 0x544   : > { %v957_v14 = vsel %vm280_vm1, %v1277_v26, %v947_v12 }
 0x547   : > { %v951_v13 = vpop.permute.xlu1 %950 }
 0x548   : > { %v959_v15 = vsel %vm958_vm2, %v957_v14, %v951_v13 }
 0x578   : > { %v955_v16 = vpop.permute.xlu0 %954 }
 0x579   : > { %v961_v17 = vsel %vm960_vm3, %v959_v15, %v955_v16 }
 0x57a   : > { %963 = vst.msk [vmem:[%s267_s19] sm:$0xff] %vm962_vm4, %v961_v17 }
 0x57b PF: > { %s15_s18 = sadd.s32 1, %s1168_s18  }
 0x57c   : > { %p12_p4 = scmp.ge.s32.totalorder %s15_s18, 4  }
 0x57e   :  { %14 = sbr.rel (!%p12_p4) target bundleno = 1 (0x1), region = 79 }

// kernel: decoder_layer.17
= control target key start
LH: loop header
LB: loop body
LE: loop exit
PB: predicated region body
PF: predicated region fallthrough
CT: control target
= control target key end

     0   :  { %vm33_vm0 = vcmask 261120   ;;  %vm18_vm1 = vcmask 523264   ;;  %v205_v2 = vmov 0.0   ;;  %s289_s1 = inlined_call_operand.vmem [shape: f32[64,32], index: 1, kind: input, shape index: {}]   ;;  %s290_s0 = inlined_call_operand.vmem [shape: f32[16,32], index: 0, kind: input, shape index: {}]   ;;  %s291_s2 = inlined_call_operand.vmem [shape: f32[1,64], index: 2, kind: input, shape index: {}]   ;;  %s292_s3 = inlined_call_operand.vmem [shape: f32[16,64], index: 3, kind: output, shape index: {}]  }
   0x1   :  { %v32_v0 = vld [vmem:[%s289_s1 + $0x38] sm:$0xff]  ;;  %v31_v1 = vld [vmem:[%s289_s1 + $0x30] sm:$0xff]  ;;  %20 = vst.msk [vmem:[#allocation2 + $0x8] sm:$0xff] %vm18_vm1, %v205_v2  ;;  %19 = vst.msk [vmem:[#allocation2] sm:$0xff] %vm18_vm1, %v205_v2 }
   0x2   :  { %185 = vmatprep.subr.msk.mxu0 %vm33_vm0, %v32_v0  ;;  %v23_v3 = vld [vmem:[%s290_s0] sm:$0xff]  ;;  %v30_v4 = vld [vmem:[%s289_s1 + $0x28] sm:$0xff]  ;;  %v28_v6 = vld [vmem:[%s289_s1 + $0x18] sm:$0xff] }
   0x3   :  { %186 = vmatpush3.xpose.msk.msra.mxu0 %vm33_vm0, %v32_v0  ;;  %201 = vmatprep.mubr.msk.f32.mxu0 %vm33_vm0, %v23_v3  ;;  %v29_v5 = vld [vmem:[%s289_s1 + $0x20] sm:$0xff]  ;;  %v27_v7 = vld [vmem:[%s289_s1 + $0x10] sm:$0xff]  ;;  %v26_v8 = vld [vmem:[%s289_s1 + $0x8] sm:$0xff] }
   0x4   :  { %187 = vmatprep.subr.msk.mxu0 %vm33_vm0, %v31_v1  ;;  %v25_v9 = vld [vmem:[%s289_s1] sm:$0xff]  ;;  %v24_v10 = vld [vmem:[%s290_s0 + $0x8] sm:$0xff] }
   0x5   :  { %v174_v17 = vld [vmem:[%s291_s2] ss:$0 sm:$0xff] }
   0x7   :  { %188 = vmatpush3.xpose.msk.msra.mxu0 %vm33_vm0, %v31_v1 }
   0x8   :  { %189 = vmatprep.subr.msk.mxu0 %vm33_vm0, %v30_v4  ;;  %v22_v11 = vld [vmem:[#allocation2 + $0x8] sm:$0xff]  ;;  %v21_v13 = vld [vmem:[#allocation2] sm:$0xff] }
   0xb   :  { %190 = vmatpush3.xpose.msk.msra.mxu0 %vm33_vm0, %v30_v4 }
   0xc   :  { %191 = vmatprep.subr.msk.mxu0 %vm33_vm0, %v29_v5 }
   0xf   :  { %192 = vmatpush3.xpose.msk.msra.mxu0 %vm33_vm0, %v29_v5 }
  0x10   :  { %193 = vmatprep.subr.msk.mxu0 %vm33_vm0, %v28_v6 }
  0x13   :  { %194 = vmatpush3.xpose.msk.msra.mxu0 %vm33_vm0, %v28_v6 }
  0x14   :  { %195 = vmatprep.subr.msk.mxu0 %vm33_vm0, %v27_v7 }
  0x17   :  { %196 = vmatpush3.xpose.msk.msra.mxu0 %vm33_vm0, %v27_v7 }
  0x18   :  { %197 = vmatprep.subr.msk.mxu0 %vm33_vm0, %v26_v8 }
  0x1b   :  { %198 = vmatpush3.xpose.msk.msra.mxu0 %vm33_vm0, %v26_v8 }
  0x1c   :  { %199 = vmatprep.subr.msk.mxu0 %vm33_vm0, %v25_v9 }
  0x1f   :  { %200 = vmatpush3.xpose.msk.msra.mxu0 %vm33_vm0, %v25_v9 }
  0x22   :  { %202 = vmatmul.mubr.msk.f32.vlgmr.msra.gmra.mxu0 %vm33_vm0, %v24_v10 }
  0xe2   :  { %v203_v12 = vpop.f32.mrf.mxu0 }
  0xe3   :  { %v140_v14 = vadd.f32 %v203_v12, %v22_v11 }
  0xe4   :  { %v130_v15 = vpop.f32.mrf.mxu0 }
  0xe5   :  { %143 = vst.msk [vmem:[#allocation2 + $0x8] sm:$0xff] %vm18_vm1, %v140_v14  ;;  %v139_v16 = vadd.f32 %v130_v15, %v21_v13 }
  0xe7   :  { %142 = vst.msk [vmem:[#allocation2] sm:$0xff] %vm18_vm1, %v139_v16 }
  0xec   :  { %v148_v18 = vld [vmem:[#allocation2 + $0x8] sm:$0xff] }
  0xed   :  { %v157_v19 = vadd.f32 %v174_v17, %v148_v18 }
  0xee   :  { %v147_v20 = vld [vmem:[#allocation2] sm:$0xff] }
  0xef   :  { %159 = vst.msk [vmem:[%s292_s3 + $0x8] sm:$0xff] %vm18_vm1, %v157_v19  ;;  %v156_v21 = vadd.f32 %v174_v17, %v147_v20 }
  0xf1   :  { %158 = vst.msk [vmem:[%s292_s3] sm:$0xff] %vm18_vm1, %v156_v21 }

// kernel: decoder_layer.22
= control target key start
LH: loop header
LB: loop body
LE: loop exit
PB: predicated region body
PF: predicated region fallthrough
CT: control target
= control target key end

     0   :  { %vm29_vm0 = vcmask 523264   ;;  %vm18_vm1 = vcmask 261120   ;;  %v173_v2 = vmov 0.0   ;;  %s237_s1 = inlined_call_operand.vmem [shape: f32[32,64], index: 1, kind: input, shape index: {}]   ;;  %s238_s0 = inlined_call_operand.vmem [shape: f32[16,64], index: 0, kind: input, shape index: {}]   ;;  %s239_s2 = inlined_call_operand.vmem [shape: f32[1,32], index: 2, kind: input, shape index: {}]   ;;  %s240_s3 = inlined_call_operand.vmem [shape: f32[16,32], index: 3, kind: output, shape index: {}]  }
   0x1   :  { %v28_v0 = vld [vmem:[%s237_s1 + $0x18] sm:$0xff]  ;;  %v27_v1 = vld [vmem:[%s237_s1 + $0x10] sm:$0xff]  ;;  %20 = vst.msk [vmem:[#allocation2 + $0x8] sm:$0xff] %vm18_vm1, %v173_v2  ;;  %19 = vst.msk [vmem:[#allocation2] sm:$0xff] %vm18_vm1, %v173_v2 }
   0x2   :  { %161 = vmatprep.subr.msk.mxu0 %vm29_vm0, %v28_v0  ;;  %v23_v3 = vld [vmem:[%s238_s0] sm:$0xff]  ;;  %v26_v4 = vld [vmem:[%s237_s1 + $0x8] sm:$0xff] }
   0x3   :  { %162 = vmatpush3.xpose.msk.msra.mxu0 %vm29_vm0, %v28_v0  ;;  %169 = vmatprep.mubr.msk.f32.mxu0 %vm29_vm0, %v23_v3  ;;  %v25_v5 = vld [vmem:[%s237_s1] sm:$0xff]  ;;  %v24_v6 = vld [vmem:[%s238_s0 + $0x8] sm:$0xff] }
   0x4   :  { %163 = vmatprep.subr.msk.mxu0 %vm29_vm0, %v27_v1  ;;  %v154_v13 = vld [vmem:[%s239_s2] ss:$0 sm:$0xff] }
   0x7   :  { %164 = vmatpush3.xpose.msk.msra.mxu0 %vm29_vm0, %v27_v1 }
   0x8   :  { %165 = vmatprep.subr.msk.mxu0 %vm29_vm0, %v26_v4  ;;  %v22_v7 = vld [vmem:[#allocation2 + $0x8] sm:$0xff]  ;;  %v21_v9 = vld [vmem:[#allocation2] sm:$0xff] }
   0xb   :  { %166 = vmatpush3.xpose.msk.msra.mxu0 %vm29_vm0, %v26_v4 }
   0xc   :  { %167 = vmatprep.subr.msk.mxu0 %vm29_vm0, %v25_v5 }
   0xf   :  { %168 = vmatpush3.xpose.msk.msra.mxu0 %vm29_vm0, %v25_v5 }
  0x12   :  { %170 = vmatmul.mubr.msk.f32.vlgmr.msra.gmra.mxu0 %vm29_vm0, %v24_v6 }
  0xd2   :  { %v171_v8 = vpop.f32.mrf.mxu0 }
  0xd3   :  { %v124_v10 = vadd.f32 %v171_v8, %v22_v7 }
  0xd4   :  { %v114_v11 = vpop.f32.mrf.mxu0 }
  0xd5   :  { %127 = vst.msk [vmem:[#allocation2 + $0x8] sm:$0xff] %vm18_vm1, %v124_v10  ;;  %v123_v12 = vadd.f32 %v114_v11, %v21_v9 }
  0xd7   :  { %126 = vst.msk [vmem:[#allocation2] sm:$0xff] %vm18_vm1, %v123_v12 }
  0xdc   :  { %v132_v14 = vld [vmem:[#allocation2 + $0x8] sm:$0xff] }
  0xdd   :  { %v141_v15 = vadd.f32 %v154_v13, %v132_v14 }
  0xde   :  { %v131_v16 = vld [vmem:[#allocation2] sm:$0xff] }
  0xdf   :  { %143 = vst.msk [vmem:[%s240_s3 + $0x8] sm:$0xff] %vm18_vm1, %v141_v15  ;;  %v140_v17 = vadd.f32 %v154_v13, %v131_v16 }
  0xe1   :  { %142 = vst.msk [vmem:[%s240_s3] sm:$0xff] %vm18_vm1, %v140_v17 }

// kernel: decoder_layer.18
= control target key start
LH: loop header
LB: loop body
LE: loop exit
PB: predicated region body
PF: predicated region fallthrough
CT: control target
= control target key end

     0   :  { %10 = vsyncpa [#allocation3], 0  ;;  %s1503_s0 = inlined_call_operand.vmem [shape: f32[2,8,32], index: 0, kind: input, shape index: {}]   ;;  %s1504_s1 = inlined_call_operand.vmem [shape: f32[2,8,32], index: 1, kind: input, shape index: {}]   ;;  %s1505_s2 = inlined_call_operand.vmem [shape: f32[2,8,32], index: 2, kind: input, shape index: {}]   ;;  %s1506_s3 = inlined_call_operand.vmem [shape: f32[2,8,32], index: 3, kind: output, shape index: {0}]   ;;  %s1507_s4 = inlined_call_operand.hbm [shape: f32[2,4,8,8], index: 4, kind: output, shape index: {1}]  }
   0x1   :  { %12 = vsyncpa [#allocation3 + $0x1], 0  ;;  %s1306_s15 = smov 0   ;;  %s1308_s16 = smov 0  }
   0x2   :  { %s1310_s17 = smov 0   ;;  %s1312_s18 = smov 0  }
   0x3 LB: > { %s1327_s19 = sadd.s32 4294967295, %s1269_s18   ;;  %s1059_s20 = sadd.s32 4294967294, %s1269_s18   ;;  %s1269_s18 = sphi %s1312_s18, %s1513_s18   ;;  %s1265_s17 = sphi %s1310_s17, %s1512_s17   ;;  %s1261_s16 = sphi %s1308_s16, %s1511_s16   ;;  %s1257_s15 = sphi %s1306_s15, %s1510_s15  }
   0x4   : > { %s1331_s21 = sadd.s32 1, %s1269_s18   ;;  %s129_s22 = sadd.s32 1, %s1265_s17 }
   0x5   : > { %s126_s23 = ssub.s32 %s1269_s18, %s1331_s21  ;;  %p139_p0 = scmp.ne.s32.totalorder %s1265_s17, %s1261_s16 }
   0x6   : > { %p127_p1 = scmp.eq.s32.totalorder %s126_s23, 0  ;;  %p140_p2 = scmp.eq.s32.totalorder %s1327_s19, 1 }
   0x7   : > { %p145_p3 = scmp.ne.s32.totalorder %s1261_s16, %s1257_s15  ;;  %p146_p4 = scmp.eq.s32.totalorder %s1059_s20, 1 }
   0x8   : > { %s1342_s24 = scalar_select %p127_p1, %s1265_s17, %s129_s22  }
   0x9   : > { %p1344_p5 = por %p140_p2, %p139_p0  ;;  %p1348_p6 = por %p146_p4, %p145_p3 }
   0xa   : > { %p1062_p7 = scmp.ge.s32.totalorder %s1269_s18, 1  ;;  %p185_p8 = scmp.lt.s32.totalorder %s1269_s18, 3 }
   0xc   : > { %p186_p9 = pnand %p1062_p7, %p185_p8 }
   0xd   : > { %p222_p10 = scmp.lt.s32.totalorder (!%p186_p9), %s1327_s19, 1  ;;  %s1273_s9 = smov (!%p186_p9), 120  }
   0xe   : > { %189 = sbr.rel (%p186_p9) target bundleno = 1408 (0x580), region = 32  ;;  %s1274_s10 = smov (!%p186_p9), 112  }
   0xf   : > { %s1275_s11 = smov (!%p186_p9), 104   ;;  %s219_s20 = sand.u32 (!%p186_p9), 1, %s1261_s16  }
  0x10   : > { %s1063_s22 = sshll.u32 (!%p186_p9), %s219_s20, 5  ;;  %s1277_s29 = smov (!%p186_p9), 16  }
  0x11   : > { %s1396_s23 = scalar_lea.vmem (!%p186_p9), [#allocation2], %s1063_s22  ;;  %s1088_s30 = sshll.u32 (!%p186_p9), %s1327_s19, 9 }
  0x13   : > { %v1271_v0 = vmov 0.0   ;;  %vm1272_vm0 = vmmov 0   ;;  %s223_s27 = scalar_select %p222_p10, %s1327_s19, 1  ;;  %vm241_vm1 = vcmask 64512  }
  0x14   : > { %1105 = vmatprep.subr.mxu0 %v1271_v0  ;;  %1107 = vmatprep.mubr.msk.f32.mxu0 %vm1272_vm0, %v1271_v0  ;;  %s1278_s19 = smov [#allocation2]  }
  0x15   : > { %1110 = vmatprep.subr.mxu1 %v1271_v0  ;;  %1112 = vmatprep.mubr.msk.f32.mxu1 %vm1272_vm0, %v1271_v0  ;;  %s1362_s28 = sshll.u32 %s223_s27, 3  ;;  %s1276_s27 = smov 8  }
  0x16   : > { %s229_s5 = scalar_lea.vmem %s1504_s1, %s1362_s28  ;;  %s225_s8 = scalar_lea.vmem %s1503_s0, %s1362_s28 }
  0x17   : > { %v239_v1 = vld [vmem:[%s229_s5] sm:$0xff]  ;;  %s233_s14 = scalar_lea.vmem %s1505_s2, %s1362_s28  ;;  %s949_s5 = sshll.u32 %s1396_s23, 4  ;;  %s1452_s5 = int_to_ptr.vmem [resolvable:$true] %s949_s5 }
  0x18   : > { %1106 = vmatpush3.xpose.msk.msra.mxu0 %vm241_vm1, %v239_v1  ;;  %v238_v2 = vld [vmem:[%s225_s8] sm:$0xff]  ;;  %406 = vrot.lane.b32.xlu1 %v239_v1, %s1273_s9  ;;  %s1450_s8 = scalar_lea.hbm %s1507_s4, %s1088_s30 }
  0x19   : > { %1120 = vmatprep.subr.mxu0 %v1271_v0  ;;  %v1388_v12 = vld [vmem:[%s233_s14] sm:$0xff] }
  0x1a   : > { %1111 = vmatpush3.msra.mxu1 %v1388_v12 }
  0x1b   : > { %1108 = vmatmul.mubr.msk.f32.vlgmr.msra.gmra.mxu0 %vm241_vm1, %v238_v2  ;;  %1115 = vmatprep.subr.mxu1 %v1271_v0 }
  0x1c   : > { %1122 = vmatprep.mubr.msk.f32.mxu0 %vm1272_vm0, %v1271_v0  ;;  %404 = vrot.lane.b32.xlu1 %v238_v2, %s1273_s9 }
  0x20   : > { %573 = vrot.lane.b32.xlu1 %v238_v2, %s1274_s10 }
  0x24   : > { %743 = vrot.lane.b32.xlu1 %v239_v1, %s1275_s11 }
  0x28   : > { %741 = vrot.lane.b32.xlu1 %v238_v2, %s1275_s11 }
  0x8a   : > { %v407_v14 = vpop.permute.xlu1 %406 }
  0x8e   : > { %v405_v15 = vpop.permute.xlu1 %404 }
  0x92   : > { %v574_v17 = vpop.permute.xlu1 %573 }
  0x96   : > { %v744_v20 = vpop.permute.xlu1 %743 }
  0x9a   : > { %v742_v21 = vpop.permute.xlu1 %741 }
  0xdb   : > { %v314_v3 = vpop.f32.mrf.mxu0 }
  0xdc   : > { %v318_v4 = vmul.f32 0.35355338, %v314_v3 }
  0xdd   : > { %v1109_v5 = vpop.f32.mrf.mxu0 }
  0xde   : > { %v319_v6 = vsel %vm241_vm1, %v318_v4, -inf }
  0xdf   : > { %320 = vmax.xlane.f32.xlu0 %v319_v6 }
 0x168   : > { %v321_v7 = vpop.xlane.xlu0 %320 }
 0x169   : > { %v322_v8 = vsub.f32 %v318_v4, %v321_v7 }
 0x16b   : > { %v323_v9 = vmul.f32 1.442695, %v322_v8 }
 0x16d   : > { %1193 = vpow2.f32 %v323_v9 }
 0x17a   : > { %v1194_v10 = vpop.eup %1193 }
 0x17b   : > { %v325_v11 = vsel %vm241_vm1, %v1194_v10, 0.0 }
 0x17c   : > { %326 = vadd.xlane.f32.xlu0 %v325_v11 }
 0x192   : > { %575 = vrot.lane.b32.xlu0 %v239_v1, %s1274_s10 }
 0x205   : > { %v327_v13 = vpop.xlane.xlu0 %326 }
 0x206   : > { %1195 = vrcp.f32 %v327_v13 }
 0x209   : > { %v576_v19 = vpop.permute.xlu0 %575 }
 0x213   : > { %v1196_v16 = vpop.eup %1195 }
 0x214   : > { %v329_v18 = vmul.f32 %v1196_v16, %v1194_v10 }
 0x216   : > { %330 = vst.msk [vmem:[%s1396_s23] sm:$0xff] %vm241_vm1, %v329_v18  ;;  %1113 = vmatmul.mubr.msk.f32.vlgmr.msra.gmra.mxu1 %vm241_vm1, %v329_v18 }
 0x217   : > { %1116 = vmatpush3.xpose.msk.msra.mxu1 %vm241_vm1, %v407_v14  ;;  %1117 = vmatprep.mubr.msk.f32.mxu1 %vm1272_vm0, %v1271_v0 }
 0x218   : > { %1125 = vmatprep.subr.mxu1 %v1271_v0 }
 0x21a   : > { %1118 = vmatmul.mubr.msk.f32.vlgmr.msra.gmra.mxu1 %vm241_vm1, %v405_v15 }
 0x21b   : > { %1126 = vmatpush3.xpose.msk.msra.mxu1 %vm241_vm1, %v576_v19  ;;  %1127 = vmatprep.mubr.msk.f32.mxu1 %vm1272_vm0, %v1271_v0 }
 0x21c   : > { %1135 = vmatprep.subr.mxu1 %v1271_v0 }
 0x21e   : > { %1128 = vmatmul.mubr.msk.f32.vlgmr.msra.gmra.mxu1 %vm241_vm1, %v574_v17 }
 0x21f   : > { %1136 = vmatpush3.xpose.msk.msra.mxu1 %vm241_vm1, %v744_v20  ;;  %1137 = vmatprep.mubr.msk.f32.mxu1 %vm1272_vm0, %v1271_v0 }
 0x222   : > { %1138 = vmatmul.mubr.msk.f32.vlgmr.msra.gmra.mxu1 %vm241_vm1, %v742_v21 }
 0x2d6   : > { %v1415_v22 = vpop.f32.mrf.mxu1 }
 0x2d8   : > { %v1114_v23 = vpop.f32.mrf.mxu1 }
 0x2da   : > { %v478_v24 = vpop.f32.mrf.mxu1 }
 0x2db   : > { %v482_v25 = vmul.f32 0.35355338, %v478_v24 }
 0x2dc   : > { %v1119_v26 = vpop.f32.mrf.mxu1 }
 0x2dd   : > { %v483_v27 = vsel %vm241_vm1, %v482_v25, -inf }
 0x2de   : > { %484 = vmax.xlane.f32.xlu1 %v483_v27  ;;  %v647_v28 = vpop.f32.mrf.mxu1 }
 0x2df   : > { %v651_v29 = vmul.f32 0.35355338, %v647_v28 }
 0x2e0   : > { %v1129_v30 = vpop.f32.mrf.mxu1 }
 0x2e1   : > { %v652_v31 = vsel %vm241_vm1, %v651_v29, -inf }
 0x2e2   : > { %653 = vmax.xlane.f32.xlu0 %v652_v31  ;;  %v815_v32 = vpop.f32.mrf.mxu1 }
 0x2e3   : > { %v819_v33 = vmul.f32 0.35355338, %v815_v32 }
 0x2e4   : > { %v1139_v34 = vpop.f32.mrf.mxu1 }
 0x2e5   : > { %v820_v35 = vsel %vm241_vm1, %v819_v33, -inf }
 0x2e6   : > { %821 = vmax.xlane.f32.xlu1 %v820_v35 }
 0x367   : > { %v485_v36 = vpop.xlane.xlu1 %484 }
 0x368   : > { %v486_v37 = vsub.f32 %v482_v25, %v485_v36 }
 0x36a   : > { %v487_v38 = vmul.f32 1.442695, %v486_v37 }
 0x36b   : > { %v654_v39 = vpop.xlane.xlu0 %653 }
 0x36c   : > { %1197 = vpow2.f32 %v487_v38  ;;  %v655_v40 = vsub.f32 %v651_v29, %v654_v39 }
 0x36e   : > { %v656_v41 = vmul.f32 1.442695, %v655_v40 }
 0x36f   : > { %v822_v46 = vpop.xlane.xlu1 %821 }
 0x370   : > { %1199 = vpow2.f32 %v656_v41  ;;  %v823_v47 = vsub.f32 %v819_v33, %v822_v46 }
 0x372   : > { %v824_v48 = vmul.f32 1.442695, %v823_v47 }
 0x374   : > { %1201 = vpow2.f32 %v824_v48 }
 0x379   : > { %v1198_v42 = vpop.eup %1197 }
 0x37a   : > { %v489_v43 = vsel %vm241_vm1, %v1198_v42, 0.0 }
 0x37b   : > { %490 = vadd.xlane.f32.xlu1 %v489_v43 }
 0x37d   : > { %v1200_v44 = vpop.eup %1199 }
 0x37e   : > { %v658_v45 = vsel %vm241_vm1, %v1200_v44, 0.0 }
 0x37f   : > { %659 = vadd.xlane.f32.xlu0 %v658_v45 }
 0x381   : > { %v1202_v49 = vpop.eup %1201 }
 0x382   : > { %v826_v50 = vsel %vm241_vm1, %v1202_v49, 0.0 }
 0x38c   : > { %665 = vrot.lane.b32.xlu1 %v1388_v12, %s1274_s10  ;;  %s1209_s10 = scalar_lea.vmem %s1452_s5, 512 }
 0x38d   : > { %p1210_p11 = scmp.ne.s32.totalorder %s1452_s5, %s1209_s10 }
 0x38f   : > { %p1211_p12 = pnand %p1210_p11, %p1344_p5 }
 0x391   : > { %p1212_p13 = pneg %p1211_p12 }
 0x395   : > { %497 = vrot.lane.b32.xlu0 %v1388_v12, %s1273_s9  ;;  %s1456_s9 = scalar_lea.sflag [#allocation3], %s219_s20 }
 0x3b0   : > { %827 = vadd.xlane.f32.xlu1 %v826_v50 }
 0x3c1   : > { %833 = vrot.lane.b32.xlu1 %v1388_v12, %s1275_s11  ;;  %s1213_s11 = sshll.u32 %s1278_s19, 4  ;;  %s1214_s11 = int_to_ptr.vmem [resolvable:$false] %s1213_s11 }
 0x3c2   : > { %s1215_s12 = scalar_lea.vmem %s1214_s11, 1024  ;;  %p1216_p0 = scmp.lt.s32.totalorder %s1452_s5, %s1214_s11 }
 0x3c3   : > { %p1217_p1 = scmp.lt.s32.totalorder %s1215_s12, %s1209_s10 }
 0x3c5   : > { %p1218_p2 = por %p1217_p1, %p1216_p0 }
 0x3c7   : > { %p1219_p3 = pnand %p1218_p2, %p1212_p13 }
 0x404   : > { %v491_v51 = vpop.xlane.xlu1 %490 }
 0x405   : > { %1203 = vrcp.f32 %v491_v51 }
 0x408   : > { %v660_v52 = vpop.xlane.xlu0 %659  ;;  %v666_v56 = vpop.permute.xlu1 %665 }
 0x409   : > { %1205 = vrcp.f32 %v660_v52 }
 0x40c   : > { %v498_v53 = vpop.permute.xlu0 %497 }
 0x40d   : > { %1121 = vmatpush3.msra.mxu0 %v498_v53 }
 0x40e   : > { %1130 = vmatprep.subr.mxu0 %v1271_v0 }
 0x412   : > { %v1204_v54 = vpop.eup %1203 }
 0x413   : > { %v493_v55 = vmul.f32 %v1204_v54, %v1198_v42 }
 0x415   : > { %1073 = vst.msk [vmem:[%s1396_s23 + $0x8] sm:$0xff] %vm241_vm1, %v493_v55  ;;  %1123 = vmatmul.mubr.msk.f32.vlgmr.msra.gmra.mxu0 %vm241_vm1, %v493_v55 }
 0x416   : > { %v1206_v57 = vpop.eup %1205  ;;  %1131 = vmatpush3.msra.mxu0 %v666_v56  ;;  %1132 = vmatprep.mubr.msk.f32.mxu0 %vm1272_vm0, %v1271_v0 }
 0x417   : > { %v662_v58 = vmul.f32 %v1206_v57, %v1200_v44  ;;  %1140 = vmatprep.subr.mxu0 %v1271_v0 }
 0x419   : > { %1077 = vst.msk [vmem:[%s1396_s23 + $0x10] sm:$0xff] %vm241_vm1, %v662_v58  ;;  %1133 = vmatmul.mubr.msk.f32.vlgmr.msra.gmra.mxu0 %vm241_vm1, %v662_v58 }
 0x41a   : > { %1142 = vmatprep.mubr.msk.f32.mxu0 %vm1272_vm0, %v1271_v0 }
 0x439   : > { %v828_v59 = vpop.xlane.xlu1 %827 }
 0x43a   : > { %1207 = vrcp.f32 %v828_v59 }
 0x43d   : > { %v834_v60 = vpop.permute.xlu1 %833 }
 0x43e   : > { %1141 = vmatpush3.msra.mxu0 %v834_v60 }
 0x447   : > { %v1208_v61 = vpop.eup %1207 }
 0x448   : > { %v830_v62 = vmul.f32 %v1208_v61, %v1202_v49 }
 0x44a   : > { %1081 = vst.msk [vmem:[%s1396_s23 + $0x18] sm:$0xff] %vm241_vm1, %v830_v62  ;;  %1143 = vmatmul.mubr.msk.f32.vlgmr.msra.gmra.mxu0 %vm241_vm1, %v830_v62 }
 0x4d5   : > { %v569_v63 = vpop.f32.mrf.mxu0 }
 0x4d6   : > { %910 = vrot.lane.b32.xlu0 %v569_v63, %s1276_s27 }
 0x4d7   : > { %v1124_v1 = vpop.f32.mrf.mxu0 }
 0x4d9   : > { %v737_v0 = vpop.f32.mrf.mxu0 }
 0x4da   : > { %914 = vrot.lane.b32.xlu1 %v737_v0, %s1277_s29 }
 0x4db   : > { %v1134_v2 = vpop.f32.mrf.mxu0 }
 0x4dc   : > { %1222 = shalt.err (!%p1219_p3)
}
 0x4dd   : > { %s1223_s13 = scalar_lea.hbm %s1450_s8, 512  ;;  %s1227_s22 = scalar_lea.hbm %s1507_s4, 1024 }
 0x4de   : > { %p1224_p4 = scmp.ne.s32.totalorder %s1450_s8, %s1223_s13  ;;  %p1228_p9 = scmp.lt.s32.totalorder %s1450_s8, %s1507_s4 }
 0x4df   : > { %p1229_p10 = scmp.lt.s32.totalorder %s1227_s22, %s1223_s13 }
 0x4e0   : > { %p1225_p7 = pnand %p1224_p4, %p1344_p5 }
 0x4e1   : > { %p1230_p11 = por %p1229_p10, %p1228_p9 }
 0x4e2   : > { %p1226_p8 = pneg %p1225_p7 }
 0x4e4   : > { %p1231_p12 = pnand %p1230_p11, %p1226_p8 }
 0x4e6   : > { %1234 = shalt.err (!%p1231_p12)
}
 0x4e7   : > { %s1279_s30 = smov 128   ;;  %s1280_s6 = smov 24   ;;  %vm922_vm2 = vcmask 130048   ;;  %vm924_vm3 = vcmask 195584   ;;  %vm926_vm4 = vcmask 261120  }
 0x4e8   : > { %1145 = dma.vmem_to_hbm [thread:$0]  (%p1344_p5), %s1452_s5, 512, %s1450_s8, %s1456_s9, %s1279_s30, %s1279_s30, %s1276_s27  }
 0x4e9   : > { %s237_s25 = scalar_lea.vmem %s1506_s3, %s1362_s28 }
 0x50a   : > { %v905_v3 = vpop.f32.mrf.mxu0 }
 0x50b   : > { %918 = vrot.lane.b32.xlu0 %v905_v3, %s1280_s6 }
 0x50c   : > { %v1144_v4 = vpop.f32.mrf.mxu0 }
 0x548   : > { %v911_v5 = vpop.permute.xlu0 %910 }
 0x549   : > { %v921_v7 = vsel %vm241_vm1, %v1415_v22, %v911_v5 }
 0x54c   : > { %v915_v6 = vpop.permute.xlu1 %914 }
 0x54d   : > { %v923_v8 = vsel %vm922_vm2, %v921_v7, %v915_v6 }
 0x57d   : > { %v919_v9 = vpop.permute.xlu0 %918 }
 0x57e   : > { %v925_v10 = vsel %vm924_vm3, %v923_v8, %v919_v9 }
 0x57f   : > { %927 = vst.msk [vmem:[%s237_s25] sm:$0xff] %vm926_vm4, %v925_v10 }
 0x580 PF: > { %p1151_p5 = scmp.ge.s32.totalorder %s1269_s18, 2  ;;  %s971_s27 = sand.u32 1, %s1257_s15  }
 0x581   : > { %s972_s5 = scalar_lea.sflag [#allocation3], %s971_s27 }
 0x582   : > { %p1148_p13 = pnand %p1151_p5, %p1348_p6 }
 0x584   : > { %p1149_p0 = pneg %p1148_p13 }
 0x586   : > { %1252 = dma.done.wait (%p1149_p0), %s972_s5, 512  }
 0x587   : > { %1254 = vsyncadd (%p1149_p0), %s972_s5, 4294966784  ;;  %p15_p1 = scmp.ge.s32.totalorder %s1331_s21, 4   ;;  %s1510_s15 = smov %s1261_s16 }
 0x588   : > { %s1511_s16 = smov %s1265_s17  ;;  %s1512_s17 = smov %s1342_s24 }
 0x589   : > { %s1513_s18 = smov %s1331_s21  ;;  %17 = sbr.rel (!%p15_p1) target bundleno = 3 (0x3), region = 88 }
 0x58e   :  { %977 = vsyncpa [#allocation3], 1 }
 0x58f   :  { %979 = vsyncpa [#allocation3 + $0x1], 1 }

// kernel: decoder_layer.21
= control target key start
LH: loop header
LB: loop body
LE: loop exit
PB: predicated region body
PF: predicated region fallthrough
CT: control target
= control target key end

     0   :  { %vm33_vm0 = vcmask 261120   ;;  %vm18_vm1 = vcmask 523264   ;;  %v207_v2 = vmov 0.0   ;;  %s291_s1 = inlined_call_operand.vmem [shape: f32[64,32], index: 1, kind: input, shape index: {}]   ;;  %s292_s0 = inlined_call_operand.vmem [shape: f32[16,32], index: 0, kind: input, shape index: {}]   ;;  %s293_s2 = inlined_call_operand.vmem [shape: f32[1,64], index: 2, kind: input, shape index: {}]   ;;  %s294_s3 = inlined_call_operand.vmem [shape: f32[16,64], index: 3, kind: output, shape index: {}]  }
   0x1   :  { %v32_v0 = vld [vmem:[%s291_s1 + $0x38] sm:$0xff]  ;;  %v31_v1 = vld [vmem:[%s291_s1 + $0x30] sm:$0xff]  ;;  %20 = vst.msk [vmem:[#allocation2 + $0x8] sm:$0xff] %vm18_vm1, %v207_v2  ;;  %19 = vst.msk [vmem:[#allocation2] sm:$0xff] %vm18_vm1, %v207_v2 }
   0x2   :  { %187 = vmatprep.subr.msk.mxu0 %vm33_vm0, %v32_v0  ;;  %v23_v3 = vld [vmem:[%s292_s0] sm:$0xff]  ;;  %v30_v4 = vld [vmem:[%s291_s1 + $0x28] sm:$0xff]  ;;  %v28_v6 = vld [vmem:[%s291_s1 + $0x18] sm:$0xff] }
   0x3   :  { %188 = vmatpush3.xpose.msk.msra.mxu0 %vm33_vm0, %v32_v0  ;;  %203 = vmatprep.mubr.msk.f32.mxu0 %vm33_vm0, %v23_v3  ;;  %v29_v5 = vld [vmem:[%s291_s1 + $0x20] sm:$0xff]  ;;  %v27_v7 = vld [vmem:[%s291_s1 + $0x10] sm:$0xff]  ;;  %v26_v8 = vld [vmem:[%s291_s1 + $0x8] sm:$0xff] }
   0x4   :  { %189 = vmatprep.subr.msk.mxu0 %vm33_vm0, %v31_v1  ;;  %v25_v9 = vld [vmem:[%s291_s1] sm:$0xff]  ;;  %v24_v10 = vld [vmem:[%s292_s0 + $0x8] sm:$0xff] }
   0x5   :  { %v176_v17 = vld [vmem:[%s293_s2] ss:$0 sm:$0xff] }
   0x7   :  { %190 = vmatpush3.xpose.msk.msra.mxu0 %vm33_vm0, %v31_v1 }
   0x8   :  { %191 = vmatprep.subr.msk.mxu0 %vm33_vm0, %v30_v4  ;;  %v22_v11 = vld [vmem:[#allocation2 + $0x8] sm:$0xff]  ;;  %v21_v13 = vld [vmem:[#allocation2] sm:$0xff] }
   0xb   :  { %192 = vmatpush3.xpose.msk.msra.mxu0 %vm33_vm0, %v30_v4 }
   0xc   :  { %193 = vmatprep.subr.msk.mxu0 %vm33_vm0, %v29_v5 }
   0xf   :  { %194 = vmatpush3.xpose.msk.msra.mxu0 %vm33_vm0, %v29_v5 }
  0x10   :  { %195 = vmatprep.subr.msk.mxu0 %vm33_vm0, %v28_v6 }
  0x13   :  { %196 = vmatpush3.xpose.msk.msra.mxu0 %vm33_vm0, %v28_v6 }
  0x14   :  { %197 = vmatprep.subr.msk.mxu0 %vm33_vm0, %v27_v7 }
  0x17   :  { %198 = vmatpush3.xpose.msk.msra.mxu0 %vm33_vm0, %v27_v7 }
  0x18   :  { %199 = vmatprep.subr.msk.mxu0 %vm33_vm0, %v26_v8 }
  0x1b   :  { %200 = vmatpush3.xpose.msk.msra.mxu0 %vm33_vm0, %v26_v8 }
  0x1c   :  { %201 = vmatprep.subr.msk.mxu0 %vm33_vm0, %v25_v9 }
  0x1f   :  { %202 = vmatpush3.xpose.msk.msra.mxu0 %vm33_vm0, %v25_v9 }
  0x22   :  { %204 = vmatmul.mubr.msk.f32.vlgmr.msra.gmra.mxu0 %vm33_vm0, %v24_v10 }
  0xe2   :  { %v205_v12 = vpop.f32.mrf.mxu0 }
  0xe3   :  { %v140_v14 = vadd.f32 %v205_v12, %v22_v11 }
  0xe4   :  { %v130_v15 = vpop.f32.mrf.mxu0 }
  0xe5   :  { %143 = vst.msk [vmem:[#allocation2 + $0x8] sm:$0xff] %vm18_vm1, %v140_v14  ;;  %v139_v16 = vadd.f32 %v130_v15, %v21_v13 }
  0xe7   :  { %142 = vst.msk [vmem:[#allocation2] sm:$0xff] %vm18_vm1, %v139_v16 }
  0xec   :  { %v148_v18 = vld [vmem:[#allocation2 + $0x8] sm:$0xff] }
  0xed   :  { %v157_v19 = vadd.f32 %v176_v17, %v148_v18 }
  0xee   :  { %v147_v20 = vld [vmem:[#allocation2] sm:$0xff] }
  0xef   :  { %v159_v21 = vmax.f32 %v157_v19, 0.0  ;;  %v156_v22 = vadd.f32 %v176_v17, %v147_v20 }
  0xf1   :  { %161 = vst.msk [vmem:[%s294_s3 + $0x8] sm:$0xff] %vm18_vm1, %v159_v21  ;;  %v158_v23 = vmax.f32 %v156_v22, 0.0 }
  0xf3   :  { %160 = vst.msk [vmem:[%s294_s3] sm:$0xff] %vm18_vm1, %v158_v23 }

</bundles_post_ra>
